<compile_context>
chip_gen: v5e
topology: v5e:2x2
jax: 0.10.0
libtpu: 0.0.40
codegen_flags: <defaults>
</compile_context>

<pallas_src>
import jax
import jax.numpy as jnp
from jax.experimental import pallas as pl
from jax.experimental.pallas import tpu as pltpu

INPUT_SIZE = 784
HIDDEN_SIZE = 500
NUM_CLASSES = 10

# Lane-aligned padded sizes (zero padding is numerically exact).
HIDDEN_PAD = 512      # 500 -> 512 (multiple of 128)
CLASSES_PAD = 128     # 10  -> 128 (lane-dense output stores)

DEFAULT_TILE_B = 1024  # amortizes per-grid-step overhead; multiple of 16


def _round_up(x, m):
    return ((x + m - 1) // m) * m


def _mlp_kernel(x_ref, w1_ref, b1_ref, w2_ref, b2_ref, o_ref):
    # x arrives f32; cast to bf16 right before the MXU feed (rides the VPU
    # slot, which is idle -- the step is MXU/DMA bound).  f32 accumulation.
    x = x_ref[...].astype(jnp.bfloat16)
    # fc1: (TILE_B, 784)bf16 @ (784, 512)bf16 -> f32, + bias, ReLU
    h = jnp.dot(x, w1_ref[...], preferred_element_type=jnp.float32)
    h = jnp.maximum(h + b1_ref[...], 0.0)
    # fc2: (TILE_B, 512)bf16 @ (512, 128)bf16 -> f32, + bias
    out = jnp.dot(h.astype(jnp.bfloat16), w2_ref[...],
                  preferred_element_type=jnp.float32)
    o_ref[...] = (out + b2_ref[...]).astype(o_ref.dtype)


def prepare_params(w1, b1, w2, b2):
    """Pad + cast parameters ONCE (hoisted out of the per-call forward path).

    w1: (784, 500), b1: (500,), w2: (500, 10), b2: (10,) -- transposed vs.
    nn.Linear so the kernel computes x @ w + b.
    """
    w1_p = jnp.pad(w1, ((0, 0), (0, HIDDEN_PAD - HIDDEN_SIZE))).astype(jnp.bfloat16)
    b1_p = jnp.pad(b1.astype(jnp.float32),
                   (0, HIDDEN_PAD - HIDDEN_SIZE)).reshape(1, HIDDEN_PAD)
    w2_p = jnp.pad(w2, ((0, HIDDEN_PAD - HIDDEN_SIZE),
                        (0, CLASSES_PAD - NUM_CLASSES))).astype(jnp.bfloat16)
    b2_p = jnp.pad(b2.astype(jnp.float32),
                   (0, CLASSES_PAD - NUM_CLASSES)).reshape(1, CLASSES_PAD)
    return w1_p, b1_p, w2_p, b2_p


def fc_neural_net_forward(x, prepared_params, *, tile_b=DEFAULT_TILE_B):
    """x: (B, 784) float; prepared_params: output of prepare_params().

    Returns (B, 10) f32 logits (same math as the PyTorch module, with bf16
    MXU inputs and f32 accumulation).
    """
    w1_p, b1_p, w2_p, b2_p = prepared_params
    B = x.shape[0]

    # --- tile-size policy --------------------------------------------------
    #  * multiple of 16 (bf16 sublane packing / (8,128) block rule)
    #  * never larger than the 16-rounded batch (small batches -> one block)
    #  * for big batches keep grid_b >= 2 so v7x's second TensorCore works.
    tile_b = max(16, _round_up(int(tile_b), 16))
    b16 = _round_up(B, 16)
    tile_b = min(tile_b, b16)
    if b16 >= 256 and tile_b >= b16:
        tile_b = _round_up((b16 + 1) // 2, 16)   # -> exactly 2 grid steps

    B_pad = _round_up(B, tile_b)
    grid_b = B_pad // tile_b

    # x stays f32 (no wrapper-side cast pass); pad rows only if needed
    # (a zero-width pad is elided by XLA).
    x_p = x.astype(jnp.float32)
    if B_pad != B:
        x_p = jnp.pad(x_p, ((0, B_pad - B), (0, 0)))

    flops = 2 * B_pad * (INPUT_SIZE * HIDDEN_PAD + HIDDEN_PAD * CLASSES_PAD)
    bytes_accessed = (
        B_pad * INPUT_SIZE * 4            # x (f32)
        + INPUT_SIZE * HIDDEN_PAD * 2     # w1 (bf16)
        + HIDDEN_PAD * 4                  # b1 (f32)
        + HIDDEN_PAD * CLASSES_PAD * 2    # w2 (bf16)
        + CLASSES_PAD * 4                 # b2 (f32)
        + B_pad * CLASSES_PAD * 2         # out (bf16)
    )

    out_pad = pl.pallas_call(
        _mlp_kernel,
        out_shape=jax.ShapeDtypeStruct((B_pad, CLASSES_PAD), jnp.bfloat16),
        grid=(grid_b,),
        in_specs=[
            pl.BlockSpec((tile_b, INPUT_SIZE), lambda i: (i, 0)),       # x tile
            pl.BlockSpec((INPUT_SIZE, HIDDEN_PAD), lambda i: (0, 0)),   # w1 resident
            pl.BlockSpec((1, HIDDEN_PAD), lambda i: (0, 0)),            # b1 resident
            pl.BlockSpec((HIDDEN_PAD, CLASSES_PAD), lambda i: (0, 0)),  # w2 resident
            pl.BlockSpec((1, CLASSES_PAD), lambda i: (0, 0)),           # b2 resident
        ],
        out_specs=pl.BlockSpec((tile_b, CLASSES_PAD), lambda i: (i, 0)),
        compiler_params=pltpu.CompilerParams(
            dimension_semantics=("parallel",),
            vmem_limit_bytes=32 << 20,
        ),
        cost_estimate=pl.CostEstimate(
            flops=flops, transcendentals=0, bytes_accessed=bytes_accessed),
    )(x_p, w1_p, b1_p, w2_p, b2_p)

    return out_pad[:B, :NUM_CLASSES].astype(jnp.float32)


def init_params(key):
    """Deterministic init mimicking torch.nn.Linear (uniform +/- 1/sqrt(fan_in))."""
    k1, k2, k3, k4 = jax.random.split(key, 4)
    bound1 = 1.0 / (INPUT_SIZE ** 0.5)
    bound2 = 1.0 / (HIDDEN_SIZE ** 0.5)
    w1 = jax.random.uniform(k1, (INPUT_SIZE, HIDDEN_SIZE), jnp.float32, -bound1, bound1)
    b1 = jax.random.uniform(k2, (HIDDEN_SIZE,), jnp.float32, -bound1, bound1)
    w2 = jax.random.uniform(k3, (HIDDEN_SIZE, NUM_CLASSES), jnp.float32, -bound2, bound2)
    b2 = jax.random.uniform(k4, (NUM_CLASSES,), jnp.float32, -bound2, bound2)
    return w1, b1, w2, b2


def _ref_forward(x, w1, b1, w2, b2):
    return jnp.maximum(x @ w1 + b1, 0.0) @ w2 + b2


if __name__ == "__main__":
    key = jax.random.PRNGKey(0)
    kx, kp = jax.random.split(key)
    w1, b1, w2, b2 = init_params(kp)
    # Pad/cast the parameters once, outside the per-call forward path.
    params = prepare_params(w1, b1, w2, b2)

    # bf16 MXU inputs + bf16 output writeback -> loosened tolerance vs f32 ref.
    ATOL = RTOL = 3e-2

    # 1) Small demo batch (single grid point path).
    batch = 8
    x = jax.random.normal(kx, (batch, INPUT_SIZE), jnp.float32)
    out = fc_neural_net_forward(x, params)
    jax.block_until_ready(out)
    ref = _ref_forward(x, w1, b1, w2, b2)
    assert out.shape == (batch, NUM_CLASSES)
    assert jnp.allclose(out, ref, atol=ATOL, rtol=RTOL), float(jnp.max(jnp.abs(out - ref)))

    # 2) Tiled path: multiple grid points + a partial final tile.
    batch2 = 300
    x2 = jax.random.normal(jax.random.PRNGKey(1), (batch2, INPUT_SIZE), jnp.float32)
    out2 = fc_neural_net_forward(x2, params, tile_b=128)
    jax.block_until_ready(out2)
    ref2 = _ref_forward(x2, w1, b1, w2, b2)
    assert out2.shape == (batch2, NUM_CLASSES)
    assert jnp.allclose(out2, ref2, atol=ATOL, rtol=RTOL), float(jnp.max(jnp.abs(out2 - ref2)))

    # 3) Default-tile path where the >=2-grid split kicks in (v7x megacore).
    batch3 = 512
    x3 = jax.random.normal(jax.random.PRNGKey(2), (batch3, INPUT_SIZE), jnp.float32)
    out3 = fc_neural_net_forward(x3, params)
    jax.block_until_ready(out3)
    ref3 = _ref_forward(x3, w1, b1, w2, b2)
    assert out3.shape == (batch3, NUM_CLASSES)
    assert jnp.allclose(out3, ref3, atol=ATOL, rtol=RTOL), float(jnp.max(jnp.abs(out3 - ref3)))

    print("KERNEL_OK")
</pallas_src>

<mosaic_0001>
module attributes {stable_mosaic.version = 11 : i64} {
  func.func @_mlp_kernel(%arg0: i32, %arg1: memref<16x784xf32, #tpu.memory_space<vmem>>, %arg2: memref<784x512xbf16, #tpu.memory_space<vmem>>, %arg3: memref<1x512xf32, #tpu.memory_space<vmem>>, %arg4: memref<512x128xbf16, #tpu.memory_space<vmem>>, %arg5: memref<1x128xf32, #tpu.memory_space<vmem>>, %arg6: memref<16x128xbf16, #tpu.memory_space<vmem>>) attributes {dimension_semantics = [#tpu.dimension_semantics<parallel>], iteration_bounds = array<i64: 1>, scalar_prefetch = 0 : i64, scratch_operands = 0 : i64, tpu.core_type = #tpu.core_type<tc>, window_params = [{transform_indices = @transform_0, window_bounds = array<i64: 16, 784>}, {pipeline_mode = #tpu.pipeline_mode<synchronous>, transform_indices = @transform_1, window_bounds = array<i64: 784, 512>}, {pipeline_mode = #tpu.pipeline_mode<synchronous>, transform_indices = @transform_2, window_bounds = array<i64: 1, 512>}, {pipeline_mode = #tpu.pipeline_mode<synchronous>, transform_indices = @transform_3, window_bounds = array<i64: 512, 128>}, {pipeline_mode = #tpu.pipeline_mode<synchronous>, transform_indices = @transform_4, window_bounds = array<i64: 1, 128>}, {transform_indices = @transform_5, window_bounds = array<i64: 16, 128>}]} {
    %c0 = arith.constant 0 : index
    %c0_0 = arith.constant 0 : index
    %0 = vector.load %arg1[%c0, %c0_0] : memref<16x784xf32, #tpu.memory_space<vmem>>, vector<16x784xf32>
    %1 = arith.truncf %0 : vector<16x784xf32> to vector<16x784xbf16>
    %c0_1 = arith.constant 0 : index
    %c0_2 = arith.constant 0 : index
    %2 = vector.load %arg2[%c0_1, %c0_2] : memref<784x512xbf16, #tpu.memory_space<vmem>>, vector<784x512xbf16>
    %cst = arith.constant dense<0.000000e+00> : vector<16x512xf32>
    %3 = tpu.matmul %1, %2, %cst {dimension_numbers = #tpu.dot_dimension_numbers<[1], [0], [0], [1], [0, 0, 1, 1], [], []>} : vector<16x784xbf16>, vector<784x512xbf16>, vector<16x512xf32> -> vector<16x512xf32>
    %c0_3 = arith.constant 0 : index
    %c0_4 = arith.constant 0 : index
    %4 = vector.load %arg3[%c0_3, %c0_4] : memref<1x512xf32, #tpu.memory_space<vmem>>, vector<1x512xf32>
    %5 = vector.broadcast %4 : vector<1x512xf32> to vector<16x512xf32>
    %6 = arith.addf %3, %5 : vector<16x512xf32>
    %cst_5 = arith.constant 0.000000e+00 : f32
    %7 = vector.broadcast %cst_5 : f32 to vector<16x512xf32>
    %8 = arith.maximumf %6, %7 : vector<16x512xf32>
    %9 = arith.truncf %8 : vector<16x512xf32> to vector<16x512xbf16>
    %c0_6 = arith.constant 0 : index
    %c0_7 = arith.constant 0 : index
    %10 = vector.load %arg4[%c0_6, %c0_7] : memref<512x128xbf16, #tpu.memory_space<vmem>>, vector<512x128xbf16>
    %cst_8 = arith.constant dense<0.000000e+00> : vector<16x128xf32>
    %11 = tpu.matmul %9, %10, %cst_8 {dimension_numbers = #tpu.dot_dimension_numbers<[1], [0], [0], [1], [0, 0, 1, 1], [], []>} : vector<16x512xbf16>, vector<512x128xbf16>, vector<16x128xf32> -> vector<16x128xf32>
    %c0_9 = arith.constant 0 : index
    %c0_10 = arith.constant 0 : index
    %12 = vector.load %arg5[%c0_9, %c0_10] : memref<1x128xf32, #tpu.memory_space<vmem>>, vector<1x128xf32>
    %13 = vector.broadcast %12 : vector<1x128xf32> to vector<16x128xf32>
    %14 = arith.addf %11, %13 : vector<16x128xf32>
    %15 = arith.truncf %14 : vector<16x128xf32> to vector<16x128xbf16>
    %c0_11 = arith.constant 0 : index
    %c0_12 = arith.constant 0 : index
    %16 = vector.load %arg6[%c0_11, %c0_12] : memref<16x128xbf16, #tpu.memory_space<vmem>>, vector<16x128xbf16>
    tpu.vector_store %arg6[%c0_11, %c0_12], %15 {strides = array<i32>} : memref<16x128xbf16, #tpu.memory_space<vmem>>, vector<16x128xbf16>,
    return
  }
  func.func @transform_0(%arg0: i32) -> (i32, i32) {
    %c0_i32 = arith.constant 0 : i32
    %c0_i32_0 = arith.constant 0 : i32
    return %arg0, %c0_i32 : i32, i32
  }
  func.func @transform_1(%arg0: i32) -> (i32, i32) {
    %c0_i32 = arith.constant 0 : i32
    %c0_i32_0 = arith.constant 0 : i32
    %c0_i32_1 = arith.constant 0 : i32
    return %c0_i32, %c0_i32_0 : i32, i32
  }
  func.func @transform_2(%arg0: i32) -> (i32, i32) {
    %c0_i32 = arith.constant 0 : i32
    %c0_i32_0 = arith.constant 0 : i32
    %c0_i32_1 = arith.constant 0 : i32
    return %c0_i32, %c0_i32_0 : i32, i32
  }
  func.func @transform_3(%arg0: i32) -> (i32, i32) {
    %c0_i32 = arith.constant 0 : i32
    %c0_i32_0 = arith.constant 0 : i32
    %c0_i32_1 = arith.constant 0 : i32
    return %c0_i32, %c0_i32_0 : i32, i32
  }
  func.func @transform_4(%arg0: i32) -> (i32, i32) {
    %c0_i32 = arith.constant 0 : i32
    %c0_i32_0 = arith.constant 0 : i32
    %c0_i32_1 = arith.constant 0 : i32
    return %c0_i32, %c0_i32_0 : i32, i32
  }
  func.func @transform_5(%arg0: i32) -> (i32, i32) {
    %c0_i32 = arith.constant 0 : i32
    %c0_i32_0 = arith.constant 0 : i32
    return %arg0, %c0_i32 : i32, i32
  }
}

</mosaic_0001>

<bundles_post_ra>
// kernel: tpu_custom_call.1
= control target key start
LH: loop header
LB: loop body
LE: loop exit
PB: predicated region body
PF: predicated region fallthrough
CT: control target
= control target key end

     0   :  { %10 = vsyncpa [#allocation3], 0  ;;  %s3445_s0 = inlined_call_operand.hbm [shape: f32[16,784], index: 0, kind: input, shape index: {}]   ;;  %s3446_s1 = inlined_call_operand.hbm [shape: bf16[784,512], index: 1, kind: input, shape index: {}]   ;;  %s3447_s2 = inlined_call_operand.hbm [shape: f32[1,512], index: 2, kind: input, shape index: {}]   ;;  %s3448_s3 = inlined_call_operand.hbm [shape: bf16[512,128], index: 3, kind: input, shape index: {}]   ;;  %s3449_s4 = inlined_call_operand.vmem [shape: f32[1,128], index: 4, kind: input, shape index: {}]   ;;  %s3450_s5 = inlined_call_operand.hbm [shape: bf16[16,128], index: 5, kind: output, shape index: {}]  }
   0x1   :  { %11 = vsyncpa [#allocation6], 0 }
   0x2   :  { %12 = vsyncpa [#allocation9], 0  ;;  %s31_s20 = sshll.u32 %s3446_s1, 4  ;;  %s32_s20 = int_to_ptr.hbm [resolvable:$true] %s31_s20 }
   0x3   :  { %13 = vsyncpa [#allocation4], 0  ;;  %s3328_s21 = smov [#allocation5]   ;;  %s18_s25 = sshll.u32 %s3445_s0, 4  ;;  %s19_s25 = int_to_ptr.hbm [resolvable:$true] %s18_s25 }
   0x4   :  { %s33_s22 = sshll.u32 %s3328_s21, 4  ;;  %s3329_s26 = smov 256   ;;  %s34_s22 = int_to_ptr.vmem [resolvable:$true] %s33_s22 }
   0x5   :  { %s3330_s27 = smov 16   ;;  %s3331_s28 = smov [#allocation2]  }
   0x6   :  { %39 = dma.hbm_to_vmem [thread:$0]  %s32_s20, 25088, %s34_s22, [#allocation6], %s3329_s26, %s3329_s26, %s3330_s27  }
   0x7   :  { %s20_s29 = sshll.u32 %s3331_s28, 4  ;;  %s3332_s30 = smov 896   ;;  %s21_s29 = int_to_ptr.vmem [resolvable:$true] %s20_s29 }
   0x8   :  { %s3333_s6 = smov 56   ;;  %s45_s8 = sshll.u32 %s3447_s2, 4  ;;  %s46_s8 = int_to_ptr.hbm [resolvable:$true] %s45_s8 }
   0x9   :  { %26 = dma.hbm_to_vmem [thread:$0]  %s19_s25, 1792, %s21_s29, [#allocation3], %s3332_s30, %s3332_s30, %s3333_s6  }
   0xa   :  { %s3334_s9 = smov [#allocation7]   ;;  %s55_s12 = sshll.u32 %s3448_s3, 4  ;;  %s56_s12 = int_to_ptr.hbm [resolvable:$true] %s55_s12 }
   0xb   :  { %s47_s10 = sshll.u32 %s3334_s9, 4  ;;  %s3335_s13 = smov [#allocation8]   ;;  %s48_s10 = int_to_ptr.vmem [resolvable:$true] %s47_s10 }
   0xc   :  { %50 = dma.hbm_to_vmem [thread:$0]  %s46_s8, 64, %s48_s10, [#allocation6]  }
   0xd   :  { %s57_s14 = sshll.u32 %s3335_s13, 4  ;;  %s3336_s15 = smov 64   ;;  %s58_s14 = int_to_ptr.vmem [resolvable:$true] %s57_s14 }
   0xe   :  { %s3337_s16 = smov 4  }
   0xf   :  { %63 = dma.hbm_to_vmem [thread:$0]  %s56_s12, 4096, %s58_s14, [#allocation9], %s3336_s15, %s3336_s15, %s3337_s16  }
  0x10   :  { %3320 = dma.done.wait [#allocation3], 1792  }
  0x11   :  { %3321 = vsyncadd [#allocation3], 4294965504 }
  0x12   :  { %3322 = dma.done.wait [#allocation6], 25152  }
  0x13   :  { %3323 = vsyncadd [#allocation6], 4294942144 }
  0x14   :  { %3324 = dma.done.wait [#allocation9], 4096  }
  0x15   :  { %3325 = vsyncadd [#allocation9], 4294963200  ;;  %v2153_v0 = vld [vmem:[#allocation5 + $0xe0] sm:$0xf]  ;;  %v2985_v1 = vld [vmem:[#allocation5 + $0xec] sm:$0xf0] }
  0x16   :  { %v2281_v2 = vld [vmem:[#allocation5 + $0x1e0] sm:$0xf]  ;;  %v2154_v3 = vor.u32 %v2985_v1, %v2153_v0  ;;  %v3017_v4 = vld [vmem:[#allocation5 + $0x1ec] sm:$0xf0]  ;;  %vm1290_vm0 = vcmask 130048   ;;  %s3338_s17 = smov [#allocation10]  }
  0x17   :  { %v2409_v5 = vld [vmem:[#allocation5 + $0x2e0] sm:$0xf]  ;;  %v3049_v6 = vld [vmem:[#allocation5 + $0x2ec] sm:$0xf0]  ;;  %v2282_v7 = vor.u32 %v3017_v4, %v2281_v2  ;;  %s2022_s18 = sshll.u32 %s3338_s17, 4  ;;  %s2024_s21 = sshll.u32 %s3450_s5, 4  ;;  %s2023_s18 = int_to_ptr.vmem [resolvable:$true] %s2022_s18  ;;  %s2025_s21 = int_to_ptr.hbm [resolvable:$true] %s2024_s21 }
  0x18   :  { %v2410_v8 = vor.u32 %v3049_v6, %v2409_v5  ;;  %v2537_v9 = vld [vmem:[#allocation5 + $0x3e0] sm:$0xf]  ;;  %v3081_v10 = vld [vmem:[#allocation5 + $0x3ec] sm:$0xf0]  ;;  %1294 = vmatpush.bf16.msra.mxu0 %v2154_v3 }
  0x19   :  { %v2137_v11 = vld [vmem:[#allocation5 + $0xc0] sm:$0xf]  ;;  %v2538_v12 = vor.u32 %v3081_v10, %v2537_v9  ;;  %v2981_v13 = vld [vmem:[#allocation5 + $0xcc] sm:$0xf0]  ;;  %1308 = vmatpush.bf16.msra.mxu1 %v2282_v7 }
  0x1a   :  { %v2265_v14 = vld [vmem:[#allocation5 + $0x1c0] sm:$0xf]  ;;  %v3013_v15 = vld [vmem:[#allocation5 + $0x1cc] sm:$0xf0]  ;;  %1322 = vmatpush.bf16.msra.mxu2 %v2410_v8  ;;  %v2138_v16 = vor.u32 %v2981_v13, %v2137_v11 }
  0x1b   :  { %v2266_v17 = vor.u32 %v3013_v15, %v2265_v14  ;;  %v2393_v18 = vld [vmem:[#allocation5 + $0x2c0] sm:$0xf]  ;;  %v3045_v19 = vld [vmem:[#allocation5 + $0x2cc] sm:$0xf0]  ;;  %1336 = vmatpush.bf16.msra.mxu3 %v2538_v12 }
  0x1c   :  { %v2521_v20 = vld [vmem:[#allocation5 + $0x3c0] sm:$0xf]  ;;  %v2394_v21 = vor.u32 %v3045_v19, %v2393_v18  ;;  %v3077_v22 = vld [vmem:[#allocation5 + $0x3cc] sm:$0xf0]  ;;  %1295 = vmatpush.bf16.msra.mxu0 %v2138_v16 }
  0x1d   :  { %v2121_v23 = vld [vmem:[#allocation5 + $0xa0] sm:$0xf]  ;;  %v2977_v24 = vld [vmem:[#allocation5 + $0xac] sm:$0xf0]  ;;  %v2522_v25 = vor.u32 %v3077_v22, %v2521_v20  ;;  %1309 = vmatpush.bf16.msra.mxu1 %v2266_v17 }
  0x1e   :  { %v2249_v26 = vld [vmem:[#allocation5 + $0x1a0] sm:$0xf]  ;;  %v3009_v27 = vld [vmem:[#allocation5 + $0x1ac] sm:$0xf0]  ;;  %v2122_v29 = vor.u32 %v2977_v24, %v2121_v23  ;;  %1323 = vmatpush.bf16.msra.mxu2 %v2394_v21 }
  0x1f   :  { %v2377_v28 = vld [vmem:[#allocation5 + $0x2a0] sm:$0xf]  ;;  %v3041_v30 = vld [vmem:[#allocation5 + $0x2ac] sm:$0xf0]  ;;  %v2250_v33 = vor.u32 %v3009_v27, %v2249_v26  ;;  %1337 = vmatpush.bf16.msra.mxu3 %v2522_v25 }
  0x20   :  { %v2505_v31 = vld [vmem:[#allocation5 + $0x3a0] sm:$0xf]  ;;  %v3073_v32 = vld [vmem:[#allocation5 + $0x3ac] sm:$0xf0]  ;;  %v2378_v34 = vor.u32 %v3041_v30, %v2377_v28  ;;  %1296 = vmatpush.bf16.msra.mxu0 %v2122_v29 }
  0x21   :  { %v2105_v35 = vld [vmem:[#allocation5 + $0x80] sm:$0xf]  ;;  %v2973_v36 = vld [vmem:[#allocation5 + $0x8c] sm:$0xf0]  ;;  %v2506_v38 = vor.u32 %v3073_v32, %v2505_v31  ;;  %1310 = vmatpush.bf16.msra.mxu1 %v2250_v33  ;;  %v2983_v32 = vld [vmem:[#allocation5 + $0xe4] sm:$0xf] }
  0x22   :  { %v2233_v37 = vld [vmem:[#allocation5 + $0x180] sm:$0xf]  ;;  %v3005_v39 = vld [vmem:[#allocation5 + $0x18c] sm:$0xf0]  ;;  %v2106_v44 = vor.u32 %v2973_v36, %v2105_v35  ;;  %1324 = vmatpush.bf16.msra.mxu2 %v2378_v34  ;;  %v2155_v33 = vld [vmem:[#allocation5 + $0xf0] sm:$0xf0] }
  0x23   :  { %v2361_v40 = vld [vmem:[#allocation5 + $0x280] sm:$0xf]  ;;  %v3037_v41 = vld [vmem:[#allocation5 + $0x28c] sm:$0xf0]  ;;  %v2234_v45 = vor.u32 %v3005_v39, %v2233_v37  ;;  %1338 = vmatpush.bf16.msra.mxu3 %v2506_v38  ;;  %v92_v36 = vld [vmem:[#allocation2 + $0x48] sm:$0xff] }
  0x24   :  { %v2489_v42 = vld [vmem:[#allocation5 + $0x380] sm:$0xf]  ;;  %v3069_v43 = vld [vmem:[#allocation5 + $0x38c] sm:$0xf0]  ;;  %v2362_v46 = vor.u32 %v3037_v41, %v2361_v40  ;;  %1297 = vmatpush.bf16.msra.mxu0 %v2106_v44  ;;  %v3015_v41 = vld [vmem:[#allocation5 + $0x1e4] sm:$0xf] }
  0x25   :  { %v2089_v47 = vld [vmem:[#allocation5 + $0x60] sm:$0xf]  ;;  %v2969_v48 = vld [vmem:[#allocation5 + $0x6c] sm:$0xf0]  ;;  %v2490_v50 = vor.u32 %v3069_v43, %v2489_v42  ;;  %1311 = vmatpush.bf16.msra.mxu1 %v2234_v45  ;;  %v90_v43 = vld [vmem:[#allocation2 + $0x38] sm:$0xff] }
  0x26   :  { %v2217_v49 = vld [vmem:[#allocation5 + $0x160] sm:$0xf]  ;;  %v3001_v51 = vld [vmem:[#allocation5 + $0x16c] sm:$0xf0]  ;;  %v2090_v56 = vor.u32 %v2969_v48, %v2089_v47  ;;  %1325 = vmatpush.bf16.msra.mxu2 %v2362_v46  ;;  %v2283_v46 = vld [vmem:[#allocation5 + $0x1f0] sm:$0xf0] }
  0x27   :  { %v2345_v52 = vld [vmem:[#allocation5 + $0x260] sm:$0xf]  ;;  %v3033_v53 = vld [vmem:[#allocation5 + $0x26c] sm:$0xf0]  ;;  %v2218_v57 = vor.u32 %v3001_v51, %v2217_v49  ;;  %1339 = vmatpush.bf16.msra.mxu3 %v2490_v50  ;;  %v86_v47 = vld [vmem:[#allocation2 + $0x18] sm:$0xff]  ;;  %v2158_v50 = vor.u32 %v2983_v32, %v2155_v33 }
  0x28   :  { %v2473_v54 = vld [vmem:[#allocation5 + $0x360] sm:$0xf]  ;;  %v3065_v55 = vld [vmem:[#allocation5 + $0x36c] sm:$0xf0]  ;;  %v2346_v58 = vor.u32 %v3033_v53, %v2345_v52  ;;  %1298 = vmatpush.bf16.msra.mxu0 %v2090_v56 }
  0x29   :  { %v2073_v59 = vld [vmem:[#allocation5 + $0x40] sm:$0xf]  ;;  %v2965_v60 = vld [vmem:[#allocation5 + $0x4c] sm:$0xf0]  ;;  %v2474_v62 = vor.u32 %v3065_v55, %v2473_v54  ;;  %1312 = vmatpush.bf16.msra.mxu1 %v2218_v57  ;;  %v2979_v57 = vld [vmem:[#allocation5 + $0xc4] sm:$0xf] }
  0x2a   :  { %v2201_v61 = vld [vmem:[#allocation5 + $0x140] sm:$0xf]  ;;  %v2997_v63 = vld [vmem:[#allocation5 + $0x14c] sm:$0xf0]  ;;  %v2074_v4 = vor.u32 %v2965_v60, %v2073_v59  ;;  %1326 = vmatpush.bf16.msra.mxu2 %v2346_v58  ;;  %v2139_v58 = vld [vmem:[#allocation5 + $0xd0] sm:$0xf0] }
  0x2b   :  { %v2329_v0 = vld [vmem:[#allocation5 + $0x240] sm:$0xf]  ;;  %v3029_v1 = vld [vmem:[#allocation5 + $0x24c] sm:$0xf0]  ;;  %v2202_v6 = vor.u32 %v2997_v63, %v2201_v61  ;;  %1340 = vmatpush.bf16.msra.mxu3 %v2474_v62  ;;  %v84_v61 = vld [vmem:[#allocation2 + $0x8] sm:$0xff]  ;;  %v2286_v63 = vor.u32 %v3015_v41, %v2283_v46 }
  0x2c   :  { %v2457_v2 = vld [vmem:[#allocation5 + $0x340] sm:$0xf]  ;;  %v3061_v3 = vld [vmem:[#allocation5 + $0x34c] sm:$0xf0]  ;;  %v2330_v7 = vor.u32 %v3029_v1, %v2329_v0  ;;  %1299 = vmatpush.bf16.msra.mxu0 %v2074_v4  ;;  %v3011_v1 = vld [vmem:[#allocation5 + $0x1c4] sm:$0xf]  ;;  %v2142_v4 = vor.u32 %v2979_v57, %v2139_v58 }
  0x2d   :  { %v2057_v5 = vld [vmem:[#allocation5 + $0x20] sm:$0xf]  ;;  %v2961_v8 = vld [vmem:[#allocation5 + $0x2c] sm:$0xf0]  ;;  %v2458_v11 = vor.u32 %v3061_v3, %v2457_v2  ;;  %1313 = vmatpush.bf16.msra.mxu1 %v2202_v6  ;;  %v2267_v2 = vld [vmem:[#allocation5 + $0x1d0] sm:$0xf0] }
  0x2e   :  { %v2185_v9 = vld [vmem:[#allocation5 + $0x120] sm:$0xf]  ;;  %v2993_v10 = vld [vmem:[#allocation5 + $0x12c] sm:$0xf0]  ;;  %v2058_v18 = vor.u32 %v2961_v8, %v2057_v5  ;;  %1327 = vmatpush.bf16.msra.mxu2 %v2330_v7  ;;  %v2219_v41 = vld [vmem:[#allocation5 + $0x170] sm:$0xf0] }
  0x2f   :  { %v2313_v12 = vld [vmem:[#allocation5 + $0x220] sm:$0xf]  ;;  %v3025_v13 = vld [vmem:[#allocation5 + $0x22c] sm:$0xf0]  ;;  %v2186_v23 = vor.u32 %v2993_v10, %v2185_v9  ;;  %1341 = vmatpush.bf16.msra.mxu3 %v2458_v11  ;;  %v2975_v10 = vld [vmem:[#allocation5 + $0xa4] sm:$0xf] }
  0x30   :  { %v2441_v14 = vld [vmem:[#allocation5 + $0x320] sm:$0xf]  ;;  %v3057_v15 = vld [vmem:[#allocation5 + $0x32c] sm:$0xf0]  ;;  %v2314_v24 = vor.u32 %v3025_v13, %v2313_v12  ;;  %1300 = vmatpush.bf16.msra.mxu0 %v2058_v18  ;;  %v2123_v11 = vld [vmem:[#allocation5 + $0xb0] sm:$0xf0]  ;;  %v2270_v12 = vor.u32 %v3011_v1, %v2267_v2 }
  0x31   :  { %v2041_v16 = vld [vmem:[#allocation5] sm:$0xf]  ;;  %v2957_v17 = vld [vmem:[#allocation5 + $0xc] sm:$0xf0]  ;;  %v2442_v28 = vor.u32 %v3057_v15, %v2441_v14  ;;  %1314 = vmatpush.bf16.msra.mxu1 %v2186_v23  ;;  %v3007_v14 = vld [vmem:[#allocation5 + $0x1a4] sm:$0xf] }
  0x32   :  { %v2169_v19 = vld [vmem:[#allocation5 + $0x100] sm:$0xf]  ;;  %v2989_v20 = vld [vmem:[#allocation5 + $0x10c] sm:$0xf0]  ;;  %v2042_v35 = vor.u32 %v2957_v17, %v2041_v16  ;;  %1328 = vmatpush.bf16.msra.mxu2 %v2314_v24  ;;  %v2251_v15 = vld [vmem:[#allocation5 + $0x1b0] sm:$0xf0]  ;;  %v2126_v17 = vor.u32 %v2975_v10, %v2123_v11 }
  0x33   :  { %v2297_v21 = vld [vmem:[#allocation5 + $0x200] sm:$0xf]  ;;  %v3021_v22 = vld [vmem:[#allocation5 + $0x20c] sm:$0xf0]  ;;  %v2170_v39 = vor.u32 %v2989_v20, %v2169_v19  ;;  %1342 = vmatpush.bf16.msra.mxu3 %v2442_v28  ;;  %v2107_v23 = vld [vmem:[#allocation5 + $0x90] sm:$0xf0]  ;;  %v2254_v24 = vor.u32 %v3007_v14, %v2251_v15 }
  0x34   :  { %v2425_v25 = vld [vmem:[#allocation5 + $0x300] sm:$0xf]  ;;  %v3053_v26 = vld [vmem:[#allocation5 + $0x30c] sm:$0xf0]  ;;  %v2298_v40 = vor.u32 %v3021_v22, %v2297_v21  ;;  %1301 = vmatpush.bf16.msra.mxu0 %v2042_v35  ;;  %v2971_v22 = vld [vmem:[#allocation5 + $0x84] sm:$0xf] }
  0x35   :  { %v2665_v27 = vld [vmem:[#allocation5 + $0x4e0] sm:$0xf]  ;;  %v3113_v29 = vld [vmem:[#allocation5 + $0x4ec] sm:$0xf0]  ;;  %v2426_v44 = vor.u32 %v3053_v26, %v2425_v25  ;;  %1315 = vmatpush.bf16.msra.mxu1 %v2170_v39  ;;  %v3003_v26 = vld [vmem:[#allocation5 + $0x184] sm:$0xf] }
  0x36   :  { %v2793_v30 = vld [vmem:[#allocation5 + $0x5e0] sm:$0xf]  ;;  %v3145_v31 = vld [vmem:[#allocation5 + $0x5ec] sm:$0xf0]  ;;  %v2666_v45 = vor.u32 %v3113_v29, %v2665_v27  ;;  %1329 = vmatpush.bf16.msra.mxu2 %v2298_v40  ;;  %v2235_v27 = vld [vmem:[#allocation5 + $0x190] sm:$0xf0]  ;;  %v2110_v29 = vor.u32 %v2971_v22, %v2107_v23 }
  0x37   :  { %v85_v34 = vld [vmem:[#allocation2 + $0x10] sm:$0xff]  ;;  %v3149_v38 = vld [vmem:[#allocation5 + $0x60c] sm:$0xf0]  ;;  %v2794_v49 = vor.u32 %v3145_v31, %v2793_v30  ;;  %1343 = vmatpush.bf16.msra.mxu3 %v2426_v44  ;;  %v2091_v35 = vld [vmem:[#allocation5 + $0x70] sm:$0xf0] }
  0x38   :  { %v2809_v37 = vld [vmem:[#allocation5 + $0x600] sm:$0xf]  ;;  %v83_v42 = vld [vmem:[#allocation2] sm:$0xff]  ;;  %v3384_v54 = vpack.c.bf16 %v92_v36, %v85_v34  ;;  %1350 = vmatpush.bf16.msrb.mxu0 %v2666_v45  ;;  %v2967_v34 = vld [vmem:[#allocation5 + $0x64] sm:$0xf] }
  0x39   :  { %v93_v48 = vld [vmem:[#allocation2 + $0x50] sm:$0xff]  ;;  %v3109_v52 = vld [vmem:[#allocation5 + $0x4cc] sm:$0xf0]  ;;  %v3386_v55 = vpack.c.bf16 %v90_v43, %v83_v42  ;;  %v2810_v59 = vor.u32 %v3149_v38, %v2809_v37  ;;  %1364 = vmatpush.bf16.msrb.mxu1 %v2794_v49  ;;  %v96_v37 = vld [vmem:[#allocation2 + $0x68] sm:$0xff]  ;;  %v2238_v38 = vor.u32 %v3003_v26, %v2235_v27  ;;  %v2094_v43 = vor.u32 %v2967_v34, %v2091_v35 }
  0x3a   :  { %v2649_v51 = vld [vmem:[#allocation5 + $0x4c0] sm:$0xf]  ;;  %v3141_v56 = vld [vmem:[#allocation5 + $0x5cc] sm:$0xf0]  ;;  %v3388_v60 = vpack.c.bf16 %v93_v48, %v86_v47  ;;  %1330 = vmatmul.bf16.vlgmr.msra.gmra.mxu2 %v3384_v54  ;;  %v2999_v40 = vld [vmem:[#allocation5 + $0x164] sm:$0xf] }
  0x3b   :  { %v2777_v53 = vld [vmem:[#allocation5 + $0x5c0] sm:$0xf]  ;;  %v91_v62 = vld [vmem:[#allocation2 + $0x40] sm:$0xff]  ;;  %v2650_v0 = vor.u32 %v3109_v52, %v2649_v51  ;;  %1392 = vmatpush.bf16.msrb.mxu3 %v2158_v50  ;;  %1302 = vmatmul.bf16.vlgmr.msra.gmra.mxu0 %v3386_v55  ;;  %v2963_v48 = vld [vmem:[#allocation5 + $0x44] sm:$0xf]  ;;  %v2222_v51 = vor.u32 %v2999_v40, %v2219_v41 }
  0x3c   :  { %v2778_v3 = vor.u32 %v3141_v56, %v2777_v53  ;;  %v2633_v5 = vld [vmem:[#allocation5 + $0x4a0] sm:$0xf]  ;;  %v3105_v6 = vld [vmem:[#allocation5 + $0x4ac] sm:$0xf0]  ;;  %v3392_v8 = vpack.c.bf16 %v91_v62, %v84_v61  ;;  %1385 = vmatpush.bf16.msrb.mxu2 %v2810_v59  ;;  %1344 = vmatmul.bf16.vlgmr.msra.gmra.mxu3 %v3388_v60  ;;  %v2075_v49 = vld [vmem:[#allocation5 + $0x50] sm:$0xf0] }
  0x3d   :  { %v2761_v7 = vld [vmem:[#allocation5 + $0x5a0] sm:$0xf]  ;;  %v3137_v9 = vld [vmem:[#allocation5 + $0x5ac] sm:$0xf0]  ;;  %1351 = vmatpush.bf16.msrb.mxu0 %v2650_v0  ;;  %v2634_v13 = vor.u32 %v3105_v6, %v2633_v5  ;;  %v2995_v53 = vld [vmem:[#allocation5 + $0x144] sm:$0xf]  ;;  %v2078_v58 = vor.u32 %v2963_v48, %v2075_v49 }
  0x3e   :  { %1365 = vmatpush.bf16.msrb.mxu1 %v2778_v3  ;;  %v2762_v16 = vor.u32 %v3137_v9, %v2761_v7  ;;  %v2617_v18 = vld [vmem:[#allocation5 + $0x480] sm:$0xf]  ;;  %v3101_v19 = vld [vmem:[#allocation5 + $0x48c] sm:$0xf0]  ;;  %v2203_v56 = vld [vmem:[#allocation5 + $0x150] sm:$0xf0] }
  0x3f   :  { %1393 = vmatpush.bf16.msrb.mxu3 %v2142_v4  ;;  %v2745_v20 = vld [vmem:[#allocation5 + $0x580] sm:$0xf]  ;;  %1316 = vmatmul.bf16.vlgmr.msra.gmra.mxu1 %v3392_v8  ;;  %v3133_v21 = vld [vmem:[#allocation5 + $0x58c] sm:$0xf0]  ;;  %v2618_v25 = vor.u32 %v3101_v19, %v2617_v18  ;;  %v2959_v0 = vld [vmem:[#allocation5 + $0x24] sm:$0xf]  ;;  %v2206_v4 = vor.u32 %v2995_v53, %v2203_v56 }
  0x40   :  { %1406 = vmatpush.bf16.msra.mxu2 %v2286_v63  ;;  %v2746_v28 = vor.u32 %v3133_v21, %v2745_v20  ;;  %v2601_v30 = vld [vmem:[#allocation5 + $0x460] sm:$0xf]  ;;  %v3097_v31 = vld [vmem:[#allocation5 + $0x46c] sm:$0xf0]  ;;  %v2059_v1 = vld [vmem:[#allocation5 + $0x30] sm:$0xf0] }
  0x41   :  { %1352 = vmatpush.bf16.msrb.mxu0 %v2634_v13  ;;  %v2729_v32 = vld [vmem:[#allocation5 + $0x560] sm:$0xf]  ;;  %v3129_v33 = vld [vmem:[#allocation5 + $0x56c] sm:$0xf0]  ;;  %v2602_v39 = vor.u32 %v3097_v31, %v2601_v30  ;;  %v2991_v2 = vld [vmem:[#allocation5 + $0x124] sm:$0xf]  ;;  %v2062_v11 = vor.u32 %v2959_v0, %v2059_v1 }
  0x42   :  { %1366 = vmatpush.bf16.msrb.mxu1 %v2762_v16  ;;  %v89_v36 = vld [vmem:[#allocation2 + $0x30] sm:$0xff]  ;;  %v2730_v42 = vor.u32 %v3129_v33, %v2729_v32  ;;  %v3093_v45 = vld [vmem:[#allocation5 + $0x44c] sm:$0xf0]  ;;  %v2187_v3 = vld [vmem:[#allocation5 + $0x130] sm:$0xf0] }
  0x43   :  { %1394 = vmatpush.bf16.msrb.mxu3 %v2126_v17  ;;  %v2585_v44 = vld [vmem:[#allocation5 + $0x440] sm:$0xf]  ;;  %v3125_v47 = vld [vmem:[#allocation5 + $0x54c] sm:$0xf0]  ;;  %v3396_v50 = vpack.c.bf16 %v96_v37, %v89_v36  ;;  %v2955_v13 = vld [vmem:[#allocation5 + $0x4] sm:$0xf]  ;;  %v2190_v21 = vor.u32 %v2991_v2, %v2187_v3 }
  0x44   :  { %1407 = vmatpush.bf16.msra.mxu2 %v2270_v12  ;;  %v2713_v46 = vld [vmem:[#allocation5 + $0x540] sm:$0xf]  ;;  %v2586_v52 = vor.u32 %v3093_v45, %v2585_v44  ;;  %v3089_v61 = vld [vmem:[#allocation5 + $0x42c] sm:$0xf0]  ;;  %v2043_v14 = vld [vmem:[#allocation5 + $0x10] sm:$0xf0] }
  0x45   :  { %1353 = vmatpush.bf16.msrb.mxu0 %v2618_v25  ;;  %v2714_v57 = vor.u32 %v3125_v47, %v2713_v46  ;;  %v2569_v59 = vld [vmem:[#allocation5 + $0x420] sm:$0xf]  ;;  %v3121_v63 = vld [vmem:[#allocation5 + $0x52c] sm:$0xf0]  ;;  %v3047_v15 = vld [vmem:[#allocation5 + $0x2e4] sm:$0xf]  ;;  %v2046_v27 = vor.u32 %v2955_v13, %v2043_v14 }
  0x46   :  { %1367 = vmatpush.bf16.msrb.mxu1 %v2746_v28  ;;  %v2697_v62 = vld [vmem:[#allocation5 + $0x520] sm:$0xf]  ;;  %v2570_v5 = vor.u32 %v3089_v61, %v2569_v59  ;;  %v3085_v7 = vld [vmem:[#allocation5 + $0x40c] sm:$0xf0]  ;;  %v2411_v16 = vld [vmem:[#allocation5 + $0x2f0] sm:$0xf0] }
  0x47   :  { %1395 = vmatpush.bf16.msrb.mxu3 %v2110_v29  ;;  %v2553_v6 = vld [vmem:[#allocation5 + $0x400] sm:$0xf]  ;;  %v2698_v10 = vor.u32 %v3121_v63, %v2697_v62  ;;  %v3117_v12 = vld [vmem:[#allocation5 + $0x50c] sm:$0xf0]  ;;  %v3079_v17 = vld [vmem:[#allocation5 + $0x3e4] sm:$0xf]  ;;  %v2414_v31 = vor.u32 %v3047_v15, %v2411_v16 }
  0x48   :  { %1408 = vmatpush.bf16.msra.mxu2 %v2254_v24  ;;  %v2681_v9 = vld [vmem:[#allocation5 + $0x500] sm:$0xf]  ;;  %v2539_v18 = vld [vmem:[#allocation5 + $0x3f0] sm:$0xf0]  ;;  %v3111_v19 = vld [vmem:[#allocation5 + $0x4e4] sm:$0xf]  ;;  %v2554_v22 = vor.u32 %v3085_v7, %v2553_v6 }
  0x49   :  { %1354 = vmatpush.bf16.msrb.mxu0 %v2602_v39  ;;  %v2667_v20 = vld [vmem:[#allocation5 + $0x4f0] sm:$0xf0]  ;;  %v94_v24 = vld [vmem:[#allocation2 + $0x58] sm:$0xff]  ;;  %v2987_v25 = vld [vmem:[#allocation5 + $0x104] sm:$0xf]  ;;  %v2682_v26 = vor.u32 %v3117_v12, %v2681_v9  ;;  %v2542_v32 = vor.u32 %v3079_v17, %v2539_v18 }
  0x4a   :  { %1368 = vmatpush.bf16.msrb.mxu1 %v2730_v42  ;;  %2823 = vmatmul.msk.bf16.vlgmr.msrb.gmra.mxu2 %vm1290_vm0, %v3396_v50  ;;  %v87_v23 = vld [vmem:[#allocation2 + $0x20] sm:$0xff]  ;;  %v88_v29 = vld [vmem:[#allocation2 + $0x28] sm:$0xff]  ;;  %v3143_v33 = vld [vmem:[#allocation5 + $0x5e4] sm:$0xf]  ;;  %v2670_v36 = vor.u32 %v3111_v19, %v2667_v20 }
  0x4b   :  { %1396 = vmatpush.bf16.msrb.mxu3 %v2094_v43  ;;  %v2171_v28 = vld [vmem:[#allocation5 + $0x110] sm:$0xf0]  ;;  %v3043_v35 = vld [vmem:[#allocation5 + $0x2c4] sm:$0xf]  ;;  %v3400_v37 = vpack.c.bf16 %v94_v24, %v87_v23 }
  0x4c   :  { %1409 = vmatpush.bf16.msra.mxu2 %v2238_v38  ;;  %v95_v30 = vld [vmem:[#allocation2 + $0x60] sm:$0xff]  ;;  %v3075_v39 = vld [vmem:[#allocation5 + $0x3c4] sm:$0xf]  ;;  %v2174_v41 = vor.u32 %v2987_v25, %v2171_v28 }
  0x4d   :  { %1355 = vmatpush.bf16.msrb.mxu0 %v2586_v52  ;;  %v2795_v34 = vld [vmem:[#allocation5 + $0x5f0] sm:$0xf0]  ;;  %v3402_v42 = vpack.c.bf16 %v95_v30, %v88_v29  ;;  %v3107_v43 = vld [vmem:[#allocation5 + $0x4c4] sm:$0xf] }
  0x4e   :  { %1369 = vmatpush.bf16.msrb.mxu1 %v2714_v57  ;;  %v2395_v38 = vld [vmem:[#allocation5 + $0x2d0] sm:$0xf0]  ;;  %v2798_v45 = vor.u32 %v3143_v33, %v2795_v34  ;;  %v3139_v48 = vld [vmem:[#allocation5 + $0x5c4] sm:$0xf] }
  0x4f   :  { %1397 = vmatpush.bf16.msrb.mxu3 %v2078_v58  ;;  %v2523_v40 = vld [vmem:[#allocation5 + $0x3d0] sm:$0xf0]  ;;  %v2398_v46 = vor.u32 %v3043_v35, %v2395_v38  ;;  %v3071_v56 = vld [vmem:[#allocation5 + $0x3a4] sm:$0xf] }
  0x50   :  { %1410 = vmatpush.bf16.msra.mxu2 %v2222_v51  ;;  %v2651_v44 = vld [vmem:[#allocation5 + $0x4d0] sm:$0xf0]  ;;  %v2526_v47 = vor.u32 %v3075_v39, %v2523_v40  ;;  %v3039_v51 = vld [vmem:[#allocation5 + $0x2a4] sm:$0xf] }
  0x51   :  { %1356 = vmatpush.bf16.msrb.mxu0 %v2570_v5  ;;  %v2779_v49 = vld [vmem:[#allocation5 + $0x5d0] sm:$0xf0]  ;;  %v2654_v52 = vor.u32 %v3107_v43, %v2651_v44  ;;  %v3103_v58 = vld [vmem:[#allocation5 + $0x4a4] sm:$0xf] }
  0x52   :  { %1370 = vmatpush.bf16.msrb.mxu1 %v2698_v10  ;;  %v2379_v53 = vld [vmem:[#allocation5 + $0x2b0] sm:$0xf0]  ;;  %v2782_v61 = vor.u32 %v3139_v48, %v2779_v49  ;;  %v3135_v0 = vld [vmem:[#allocation5 + $0x5a4] sm:$0xf] }
  0x53   :  { %1398 = vmatpush.bf16.msrb.mxu3 %v2062_v11  ;;  %v2507_v57 = vld [vmem:[#allocation5 + $0x3b0] sm:$0xf0]  ;;  %v2382_v62 = vor.u32 %v3039_v51, %v2379_v53  ;;  %v3035_v2 = vld [vmem:[#allocation5 + $0x284] sm:$0xf] }
  0x54   :  { %1411 = vmatpush.bf16.msra.mxu2 %v2206_v4  ;;  %v2635_v59 = vld [vmem:[#allocation5 + $0x4b0] sm:$0xf0]  ;;  %v2510_v63 = vor.u32 %v3071_v56, %v2507_v57  ;;  %v3067_v5 = vld [vmem:[#allocation5 + $0x384] sm:$0xf] }
  0x55   :  { %1357 = vmatpush.bf16.msrb.mxu0 %v2554_v22  ;;  %v2763_v1 = vld [vmem:[#allocation5 + $0x5b0] sm:$0xf0]  ;;  %v2638_v3 = vor.u32 %v3103_v58, %v2635_v59  ;;  %v3099_v7 = vld [vmem:[#allocation5 + $0x484] sm:$0xf] }
  0x56   :  { %1371 = vmatpush.bf16.msrb.mxu1 %v2682_v26  ;;  %v2363_v4 = vld [vmem:[#allocation5 + $0x290] sm:$0xf0]  ;;  %v2766_v10 = vor.u32 %v3135_v0, %v2763_v1  ;;  %v3131_v13 = vld [vmem:[#allocation5 + $0x584] sm:$0xf]  ;;  %v2161_v0 = vld [vmem:[#allocation5 + $0xe8] sm:$0xf] }
  0x57   :  { %1399 = vmatpush.bf16.msrb.mxu3 %v2046_v27  ;;  %v2491_v6 = vld [vmem:[#allocation5 + $0x390] sm:$0xf0]  ;;  %v2366_v11 = vor.u32 %v3035_v2, %v2363_v4  ;;  %v3031_v15 = vld [vmem:[#allocation5 + $0x264] sm:$0xf]  ;;  %v2986_v1 = vld [vmem:[#allocation5 + $0xf4] sm:$0xf0] }
  0x58   :  { %1412 = vmatpush.bf16.msra.mxu2 %v2190_v21  ;;  %1358 = vmatmul.bf16.vlgmr.msrb.gmra.mxu0 %v3400_v37  ;;  %v2619_v9 = vld [vmem:[#allocation5 + $0x490] sm:$0xf0]  ;;  %v2494_v12 = vor.u32 %v3067_v5, %v2491_v6  ;;  %v3063_v18 = vld [vmem:[#allocation5 + $0x364] sm:$0xf]  ;;  %v2417_v5 = vld [vmem:[#allocation5 + $0x2e8] sm:$0xf] }
  0x59   :  { %1420 = vmatpush.bf16.msra.mxu0 %v2414_v31  ;;  %1372 = vmatmul.bf16.vlgmr.msrb.gmra.mxu1 %v3402_v42  ;;  %v2747_v14 = vld [vmem:[#allocation5 + $0x590] sm:$0xf0]  ;;  %v2622_v16 = vor.u32 %v3099_v7, %v2619_v9  ;;  %v3095_v20 = vld [vmem:[#allocation5 + $0x464] sm:$0xf]  ;;  %v3050_v6 = vld [vmem:[#allocation5 + $0x2f4] sm:$0xf0] }
  0x5a   :  { %1434 = vmatpush.bf16.msra.mxu1 %v2542_v32  ;;  %1400 = vmatmul.bf16.vlgmr.msrb.gmra.mxu3 %v3386_v55  ;;  %v2347_v17 = vld [vmem:[#allocation5 + $0x270] sm:$0xf0]  ;;  %v2750_v22 = vor.u32 %v3131_v13, %v2747_v14  ;;  %v3127_v25 = vld [vmem:[#allocation5 + $0x564] sm:$0xf]  ;;  %v2162_v13 = vor.u32 %v2986_v1, %v2161_v0  ;;  %v2545_v14 = vld [vmem:[#allocation5 + $0x3e8] sm:$0xf] }
  0x5b   :  { %1448 = vmatpush.bf16.msra.mxu3 %v2670_v36  ;;  %v2475_v19 = vld [vmem:[#allocation5 + $0x370] sm:$0xf0]  ;;  %v2350_v23 = vor.u32 %v3031_v15, %v2347_v17  ;;  %v3027_v27 = vld [vmem:[#allocation5 + $0x244] sm:$0xf]  ;;  %v3082_v15 = vld [vmem:[#allocation5 + $0x3f4] sm:$0xf0] }
  0x5c   :  { %1413 = vmatpush.bf16.msra.mxu2 %v2174_v41  ;;  %v2603_v21 = vld [vmem:[#allocation5 + $0x470] sm:$0xf0]  ;;  %v2478_v24 = vor.u32 %v3063_v18, %v2475_v19  ;;  %v3059_v30 = vld [vmem:[#allocation5 + $0x344] sm:$0xf]  ;;  %v2289_v17 = vld [vmem:[#allocation5 + $0x1e8] sm:$0xf]  ;;  %v2418_v19 = vor.u32 %v3050_v6, %v2417_v5 }
  0x5d   :  { %1421 = vmatpush.bf16.msra.mxu0 %v2398_v46  ;;  %v2731_v26 = vld [vmem:[#allocation5 + $0x570] sm:$0xf0]  ;;  %v2606_v28 = vor.u32 %v3095_v20, %v2603_v21  ;;  %v3091_v32 = vld [vmem:[#allocation5 + $0x444] sm:$0xf]  ;;  %v3018_v18 = vld [vmem:[#allocation5 + $0x1f4] sm:$0xf0] }
  0x5e   :  { %1435 = vmatpush.bf16.msra.mxu1 %v2526_v47  ;;  %v2331_v29 = vld [vmem:[#allocation5 + $0x250] sm:$0xf0]  ;;  %v2734_v34 = vor.u32 %v3127_v25, %v2731_v26  ;;  %v3123_v38 = vld [vmem:[#allocation5 + $0x544] sm:$0xf]  ;;  %v2145_v21 = vld [vmem:[#allocation5 + $0xc8] sm:$0xf]  ;;  %v2290_v26 = vor.u32 %v3018_v18, %v2289_v17 }
  0x5f   :  { %1449 = vmatpush.bf16.msra.mxu3 %v2654_v52  ;;  %1414 = vmatmul.bf16.vlgmr.msra.gmra.mxu2 %v3392_v8  ;;  %v2459_v31 = vld [vmem:[#allocation5 + $0x350] sm:$0xf0]  ;;  %v2334_v35 = vor.u32 %v3027_v27, %v2331_v29  ;;  %v3023_v40 = vld [vmem:[#allocation5 + $0x224] sm:$0xf]  ;;  %v3046_v25 = vld [vmem:[#allocation5 + $0x2d4] sm:$0xf0] }
  0x60   :  { %1462 = vmatpush.bf16.msrb.mxu2 %v2798_v45  ;;  %v2587_v33 = vld [vmem:[#allocation5 + $0x450] sm:$0xf0]  ;;  %v2462_v36 = vor.u32 %v3059_v30, %v2459_v31  ;;  %v3055_v44 = vld [vmem:[#allocation5 + $0x324] sm:$0xf]  ;;  %v2529_v27 = vld [vmem:[#allocation5 + $0x3c8] sm:$0xf] }
  0x61   :  { %1422 = vmatpush.bf16.msra.mxu0 %v2382_v62  ;;  %v2715_v39 = vld [vmem:[#allocation5 + $0x550] sm:$0xf0]  ;;  %v2590_v41 = vor.u32 %v3091_v32, %v2587_v33  ;;  %v3087_v46 = vld [vmem:[#allocation5 + $0x424] sm:$0xf]  ;;  %v2273_v30 = vld [vmem:[#allocation5 + $0x1c8] sm:$0xf] }
  0x62   :  { %1436 = vmatpush.bf16.msra.mxu1 %v2510_v63  ;;  %v2315_v43 = vld [vmem:[#allocation5 + $0x230] sm:$0xf0]  ;;  %v2718_v48 = vor.u32 %v3123_v38, %v2715_v39  ;;  %v3119_v49 = vld [vmem:[#allocation5 + $0x524] sm:$0xf]  ;;  %v3014_v31 = vld [vmem:[#allocation5 + $0x1d4] sm:$0xf0] }
  0x63   :  { %1450 = vmatpush.bf16.msra.mxu3 %v2638_v3  ;;  %v2443_v45 = vld [vmem:[#allocation5 + $0x330] sm:$0xf0]  ;;  %v2318_v52 = vor.u32 %v3023_v40, %v2315_v43  ;;  %v3019_v56 = vld [vmem:[#allocation5 + $0x204] sm:$0xf]  ;;  %v2129_v33 = vld [vmem:[#allocation5 + $0xa8] sm:$0xf]  ;;  %v2274_v39 = vor.u32 %v3014_v31, %v2273_v30 }
  0x64   :  { %1463 = vmatpush.bf16.msrb.mxu2 %v2782_v61  ;;  %v2571_v47 = vld [vmem:[#allocation5 + $0x430] sm:$0xf0]  ;;  %v2446_v53 = vor.u32 %v3055_v44, %v2443_v45  ;;  %v3051_v58 = vld [vmem:[#allocation5 + $0x304] sm:$0xf]  ;;  %v3042_v38 = vld [vmem:[#allocation5 + $0x2b4] sm:$0xf0] }
  0x65   :  { %1423 = vmatpush.bf16.msra.mxu0 %v2366_v11  ;;  %v2699_v51 = vld [vmem:[#allocation5 + $0x530] sm:$0xf0]  ;;  %v2574_v59 = vor.u32 %v3087_v46, %v2571_v47  ;;  %v3083_v62 = vld [vmem:[#allocation5 + $0x404] sm:$0xf]  ;;  %v2513_v40 = vld [vmem:[#allocation5 + $0x3a8] sm:$0xf] }
  0x66   :  { %1437 = vmatpush.bf16.msra.mxu1 %v2494_v12  ;;  %v2299_v57 = vld [vmem:[#allocation5 + $0x210] sm:$0xf0]  ;;  %v3147_v2 = vld [vmem:[#allocation5 + $0x604] sm:$0xf]  ;;  %v2702_v3 = vor.u32 %v3119_v49, %v2699_v51  ;;  %v2257_v44 = vld [vmem:[#allocation5 + $0x1a8] sm:$0xf] }
  0x67   :  { %1451 = vmatpush.bf16.msra.mxu3 %v2622_v16  ;;  %v2427_v61 = vld [vmem:[#allocation5 + $0x310] sm:$0xf0]  ;;  %v2302_v7 = vor.u32 %v3019_v56, %v2299_v57  ;;  %v3010_v45 = vld [vmem:[#allocation5 + $0x1b4] sm:$0xf0]  ;;  %v2113_v47 = vld [vmem:[#allocation5 + $0x88] sm:$0xf] }
  0x68   :  { %1464 = vmatpush.bf16.msrb.mxu2 %v2766_v10  ;;  %v2555_v63 = vld [vmem:[#allocation5 + $0x410] sm:$0xf0]  ;;  %v2430_v9 = vor.u32 %v3051_v58, %v2427_v61  ;;  %v3115_v10 = vld [vmem:[#allocation5 + $0x504] sm:$0xf]  ;;  %v2369_v51 = vld [vmem:[#allocation5 + $0x288] sm:$0xf] }
  0x69   :  { %1424 = vmatpush.bf16.msra.mxu0 %v2350_v23  ;;  %v2811_v4 = vld [vmem:[#allocation5 + $0x610] sm:$0xf0]  ;;  %v2558_v12 = vor.u32 %v3083_v62, %v2555_v63  ;;  %v2546_v23 = vor.u32 %v3082_v15, %v2545_v14  ;;  %v2497_v56 = vld [vmem:[#allocation5 + $0x388] sm:$0xf]  ;;  %v3070_v57 = vld [vmem:[#allocation5 + $0x394] sm:$0xf0] }
  0x6a   :  { %1438 = vmatpush.bf16.msra.mxu1 %v2478_v24  ;;  %v2683_v11 = vld [vmem:[#allocation5 + $0x510] sm:$0xf0]  ;;  %v2814_v16 = vor.u32 %v3147_v2, %v2811_v4  ;;  %v2401_v24 = vld [vmem:[#allocation5 + $0x2c8] sm:$0xf]  ;;  %v3006_v61 = vld [vmem:[#allocation5 + $0x194] sm:$0xf0]  ;;  %v2498_v1 = vor.u32 %v3070_v57, %v2497_v56 }
  0x6b   :  { %1452 = vmatpush.bf16.msra.mxu3 %v2606_v28  ;;  %v2686_v20 = vor.u32 %v3115_v10, %v2683_v11  ;;  %v3078_v28 = vld [vmem:[#allocation5 + $0x3d4] sm:$0xf0]  ;;  %v2402_v32 = vor.u32 %v3046_v25, %v2401_v24  ;;  %v2097_v63 = vld [vmem:[#allocation5 + $0x68] sm:$0xf]  ;;  %v2984_v56 = vld [vmem:[#allocation5 + $0xec] sm:$0xf] }
  0x6c   :  { %1465 = vmatpush.bf16.msrb.mxu2 %v2750_v22  ;;  %v2982_v22 = vld [vmem:[#allocation5 + $0xd4] sm:$0xf0]  ;;  %v2353_v2 = vld [vmem:[#allocation5 + $0x268] sm:$0xf]  ;;  %v2163_v57 = vld [vmem:[#allocation5 + $0xf8] sm:$0xf0] }
  0x6d   :  { %1425 = vmatpush.bf16.msra.mxu0 %v2334_v35  ;;  %v2146_v29 = vor.u32 %v2982_v22, %v2145_v21  ;;  %v2530_v35 = vor.u32 %v3078_v28, %v2529_v27  ;;  %v2970_v0 = vld [vmem:[#allocation5 + $0x74] sm:$0xf0]  ;;  %v2481_v5 = vld [vmem:[#allocation5 + $0x368] sm:$0xf] }
  0x6e   :  { %1439 = vmatpush.bf16.msra.mxu1 %v2462_v36  ;;  %v2385_v36 = vld [vmem:[#allocation5 + $0x2a8] sm:$0xf]  ;;  %v3066_v6 = vld [vmem:[#allocation5 + $0x374] sm:$0xf0] }
  0x6f   :  { %1453 = vmatpush.bf16.msra.mxu3 %v2590_v41  ;;  %v3074_v41 = vld [vmem:[#allocation5 + $0x3b4] sm:$0xf0]  ;;  %v2386_v46 = vor.u32 %v3042_v38, %v2385_v36  ;;  %v2482_v14 = vor.u32 %v3066_v6, %v2481_v5  ;;  %v2337_v15 = vld [vmem:[#allocation5 + $0x248] sm:$0xf]  ;;  %v2166_v6 = vor.u32 %v2984_v56, %v2163_v57 }
  0x70   :  { %1466 = vmatpush.bf16.msrb.mxu2 %v2734_v34  ;;  %v2978_v34 = vld [vmem:[#allocation5 + $0xb4] sm:$0xf0]  ;;  %v2514_v49 = vor.u32 %v3074_v41, %v2513_v40  ;;  %v2465_v18 = vld [vmem:[#allocation5 + $0x348] sm:$0xf] }
  0x71   :  { %1426 = vmatpush.bf16.msra.mxu0 %v2318_v52  ;;  %v2130_v43 = vor.u32 %v2978_v34, %v2129_v33  ;;  %v3038_v52 = vld [vmem:[#allocation5 + $0x294] sm:$0xf0]  ;;  %v2209_v21 = vld [vmem:[#allocation5 + $0x148] sm:$0xf] }
  0x72   :  { %1440 = vmatpush.bf16.msra.mxu1 %v2446_v53  ;;  %v2258_v53 = vor.u32 %v3010_v45, %v2257_v44  ;;  %v2370_v62 = vor.u32 %v3038_v52, %v2369_v51  ;;  %v3002_v10 = vld [vmem:[#allocation5 + $0x174] sm:$0xf0]  ;;  %v2065_v24 = vld [vmem:[#allocation5 + $0x28] sm:$0xf] }
  0x73   :  { %1454 = vmatpush.bf16.msra.mxu3 %v2574_v59  ;;  %v2241_v59 = vld [vmem:[#allocation5 + $0x188] sm:$0xf]  ;;  %v2998_v22 = vld [vmem:[#allocation5 + $0x154] sm:$0xf0] }
  0x74   :  { %1467 = vmatpush.bf16.msrb.mxu2 %v2718_v48  ;;  %v2974_v48 = vld [vmem:[#allocation5 + $0x94] sm:$0xf0]  ;;  %v2242_v4 = vor.u32 %v3006_v61, %v2241_v59  ;;  %v2321_v27 = vld [vmem:[#allocation5 + $0x228] sm:$0xf] }
  0x75   :  { %1427 = vmatpush.bf16.msra.mxu0 %v2302_v7  ;;  %v2114_v58 = vor.u32 %v2974_v48, %v2113_v47  ;;  %v2098_v7 = vor.u32 %v2970_v0, %v2097_v63  ;;  %v2962_v25 = vld [vmem:[#allocation5 + $0x34] sm:$0xf0]  ;;  %v2449_v30 = vld [vmem:[#allocation5 + $0x328] sm:$0xf] }
  0x76   :  { %1441 = vmatpush.bf16.msra.mxu1 %v2430_v9  ;;  %v2225_v9 = vld [vmem:[#allocation5 + $0x168] sm:$0xf]  ;;  %v3026_v28 = vld [vmem:[#allocation5 + $0x234] sm:$0xf0] }
  0x77   :  { %1455 = vmatpush.bf16.msra.mxu3 %v2558_v12  ;;  %v2081_v12 = vld [vmem:[#allocation5 + $0x48] sm:$0xf]  ;;  %v2226_v17 = vor.u32 %v3002_v10, %v2225_v9  ;;  %v3058_v31 = vld [vmem:[#allocation5 + $0x334] sm:$0xf0]  ;;  %v2322_v36 = vor.u32 %v3026_v28, %v2321_v27  ;;  %v2980_v9 = vld [vmem:[#allocation5 + $0xcc] sm:$0xf] }
  0x78   :  { %1468 = vmatpush.bf16.msrb.mxu2 %v2702_v3  ;;  %1428 = vmatmul.bf16.vlgmr.msra.gmra.mxu0 %v3384_v54  ;;  %v3034_v3 = vld [vmem:[#allocation5 + $0x274] sm:$0xf0]  ;;  %v2193_v33 = vld [vmem:[#allocation5 + $0x128] sm:$0xf]  ;;  %v2450_v41 = vor.u32 %v3058_v31, %v2449_v30  ;;  %v2147_v10 = vld [vmem:[#allocation5 + $0xd8] sm:$0xf0] }
  0x79   :  { %1518 = vmatpush.bf16.msrb.mxu0 %v2418_v19  ;;  %1442 = vmatmul.bf16.vlgmr.msra.gmra.mxu1 %v3388_v60  ;;  %v2354_v11 = vor.u32 %v3034_v3, %v2353_v2  ;;  %v3062_v19 = vld [vmem:[#allocation5 + $0x354] sm:$0xf0]  ;;  %v2305_v44 = vld [vmem:[#allocation5 + $0x208] sm:$0xf]  ;;  %v3016_v3 = vld [vmem:[#allocation5 + $0x1ec] sm:$0xf] }
  0x7a   :  { %1490 = vmatpush.bf16.msrb.mxu1 %v2162_v13  ;;  %1456 = vmatmul.bf16.vlgmr.msra.gmra.mxu3 %v3400_v37  ;;  %v2966_v13 = vld [vmem:[#allocation5 + $0x54] sm:$0xf0]  ;;  %v2801_v61 = vld [vmem:[#allocation5 + $0x5e8] sm:$0xf]  ;;  %v2259_v30 = vld [vmem:[#allocation5 + $0x1b8] sm:$0xf0] }
  0x7b   :  { %1483 = vmatpush.bf16.msrb.mxu3 %v2814_v16  ;;  %v3030_v16 = vld [vmem:[#allocation5 + $0x254] sm:$0xf0]  ;;  %v2657_v63 = vld [vmem:[#allocation5 + $0x4c8] sm:$0xf] }
  0x7c   :  { %1469 = vmatpush.bf16.msrb.mxu2 %v2686_v20  ;;  %v2082_v20 = vor.u32 %v2966_v13, %v2081_v12  ;;  %v2994_v34 = vld [vmem:[#allocation5 + $0x134] sm:$0xf0]  ;;  %v2785_v13 = vld [vmem:[#allocation5 + $0x5c8] sm:$0xf] }
  0x7d   :  { %1519 = vmatpush.bf16.msrb.mxu0 %v2402_v32  ;;  %v2066_v32 = vor.u32 %v2962_v25, %v2065_v24  ;;  %v2958_v38 = vld [vmem:[#allocation5 + $0x14] sm:$0xf0]  ;;  %v2194_v47 = vor.u32 %v2994_v34, %v2193_v33  ;;  %v2769_v25 = vld [vmem:[#allocation5 + $0x5a8] sm:$0xf]  ;;  %v2972_v33 = vld [vmem:[#allocation5 + $0x8c] sm:$0xf] }
  0x7e   :  { %1491 = vmatpush.bf16.msrb.mxu1 %v2146_v29  ;;  %v2210_v29 = vor.u32 %v2998_v22, %v2209_v21  ;;  %v3114_v40 = vld [vmem:[#allocation5 + $0x4f4] sm:$0xf0]  ;;  %v2976_v21 = vld [vmem:[#allocation5 + $0xac] sm:$0xf]  ;;  %v2131_v22 = vld [vmem:[#allocation5 + $0xb8] sm:$0xf0] }
  0x7f   :  { %1504 = vmatpush.bf16.msra.mxu3 %v2290_v26  ;;  %1470 = vmatmul.bf16.vlgmr.msrb.gmra.mxu2 %v3402_v42  ;;  %v2466_v26 = vor.u32 %v3062_v19, %v2465_v18  ;;  %v3022_v45 = vld [vmem:[#allocation5 + $0x214] sm:$0xf0]  ;;  %v2275_v18 = vld [vmem:[#allocation5 + $0x1d8] sm:$0xf0]  ;;  %v2150_v19 = vor.u32 %v2980_v9, %v2147_v10  ;;  %v2625_v27 = vld [vmem:[#allocation5 + $0x488] sm:$0xf]  ;;  %v2134_v31 = vor.u32 %v2976_v21, %v2131_v22 }
  0x80   :  { %1532 = vmatpush.bf16.msra.mxu2 %v2546_v23  ;;  %v2338_v23 = vor.u32 %v3030_v16, %v2337_v15  ;;  %v3054_v48 = vld [vmem:[#allocation5 + $0x314] sm:$0xf0]  ;;  %v2306_v59 = vor.u32 %v3022_v45, %v2305_v44  ;;  %v2641_v15 = vld [vmem:[#allocation5 + $0x4a8] sm:$0xf]  ;;  %v2115_v34 = vld [vmem:[#allocation5 + $0x98] sm:$0xf0] }
  0x81   :  { %1520 = vmatpush.bf16.msrb.mxu0 %v2386_v46  ;;  %v2433_v46 = vld [vmem:[#allocation5 + $0x308] sm:$0xf]  ;;  %v3150_v51 = vld [vmem:[#allocation5 + $0x614] sm:$0xf0]  ;;  %v2243_v44 = vld [vmem:[#allocation5 + $0x198] sm:$0xf0]  ;;  %v2118_v45 = vor.u32 %v2972_v33, %v2115_v34 }
  0x82   :  { %1492 = vmatpush.bf16.msrb.mxu1 %v2130_v43  ;;  %v2177_v43 = vld [vmem:[#allocation5 + $0x108] sm:$0xf]  ;;  %v2434_v0 = vor.u32 %v3054_v48, %v2433_v46  ;;  %v3106_v16 = vld [vmem:[#allocation5 + $0x4b4] sm:$0xf0]  ;;  %v2099_v48 = vld [vmem:[#allocation5 + $0x78] sm:$0xf0] }
  0x83   :  { %1505 = vmatpush.bf16.msra.mxu3 %v2274_v39  ;;  %v2673_v39 = vld [vmem:[#allocation5 + $0x4e8] sm:$0xf]  ;;  %v3102_v28 = vld [vmem:[#allocation5 + $0x494] sm:$0xf0]  ;;  %v2211_v9 = vld [vmem:[#allocation5 + $0x158] sm:$0xf0] }
  0x84   :  { %1533 = vmatpush.bf16.msra.mxu2 %v2530_v35  ;;  %v2049_v35 = vld [vmem:[#allocation5 + $0x8] sm:$0xf]  ;;  %v3094_v57 = vld [vmem:[#allocation5 + $0x454] sm:$0xf0]  ;;  %v2195_v21 = vld [vmem:[#allocation5 + $0x138] sm:$0xf0] }
  0x85   :  { %1521 = vmatpush.bf16.msrb.mxu0 %v2370_v62  ;;  %v2050_v52 = vor.u32 %v2958_v38, %v2049_v35  ;;  %v3146_v62 = vld [vmem:[#allocation5 + $0x5f4] sm:$0xf0]  ;;  %v2626_v35 = vor.u32 %v3102_v28, %v2625_v27  ;;  %v2753_v38 = vld [vmem:[#allocation5 + $0x588] sm:$0xf]  ;;  %v2956_v27 = vld [vmem:[#allocation5 + $0xc] sm:$0xf] }
  0x86   :  { %1493 = vmatpush.bf16.msrb.mxu1 %v2114_v58  ;;  %v2674_v58 = vor.u32 %v3114_v40, %v2673_v39  ;;  %v3134_v39 = vld [vmem:[#allocation5 + $0x594] sm:$0xf0]  ;;  %v2609_v40 = vld [vmem:[#allocation5 + $0x468] sm:$0xf]  ;;  %v2051_v28 = vld [vmem:[#allocation5 + $0x18] sm:$0xf0] }
  0x87   :  { %1506 = vmatpush.bf16.msra.mxu3 %v2258_v53  ;;  %v2990_v53 = vld [vmem:[#allocation5 + $0x114] sm:$0xf0]  ;;  %v2754_v46 = vor.u32 %v3134_v39, %v2753_v38  ;;  %v2593_v56 = vld [vmem:[#allocation5 + $0x448] sm:$0xf]  ;;  %v2547_v33 = vld [vmem:[#allocation5 + $0x3f8] sm:$0xf0]  ;;  %v2054_v39 = vor.u32 %v2956_v27, %v2051_v28 }
  0x88   :  { %1534 = vmatpush.bf16.msra.mxu2 %v2514_v49  ;;  %v2817_v49 = vld [vmem:[#allocation5 + $0x608] sm:$0xf]  ;;  %v2178_v5 = vor.u32 %v2990_v53, %v2177_v43  ;;  %v3004_v43 = vld [vmem:[#allocation5 + $0x18c] sm:$0xf]  ;;  %v3130_v53 = vld [vmem:[#allocation5 + $0x574] sm:$0xf0] }
  0x89   :  { %1522 = vmatpush.bf16.msrb.mxu0 %v2354_v11  ;;  %v2818_v2 = vor.u32 %v3150_v51, %v2817_v49  ;;  %v2246_v51 = vor.u32 %v3004_v43, %v2243_v44  ;;  %v3044_v38 = vld [vmem:[#allocation5 + $0x2cc] sm:$0xf]  ;;  %v2179_v43 = vld [vmem:[#allocation5 + $0x118] sm:$0xf0] }
  0x8a   :  { %1494 = vmatpush.bf16.msrb.mxu1 %v2098_v7  ;;  %2824 = vmatmul.msk.bf16.vlgmr.msrb.gmra.mxu3 %vm1290_vm0, %v3396_v50  ;;  %v2802_v7 = vor.u32 %v3146_v62, %v2801_v61  ;;  %v2483_v28 = vld [vmem:[#allocation5 + $0x378] sm:$0xf0] }
  0x8b   :  { %1507 = vmatpush.bf16.msra.mxu3 %v2242_v4  ;;  %v2291_v4 = vld [vmem:[#allocation5 + $0x1f8] sm:$0xf0] }
  0x8c   :  { %1535 = vmatpush.bf16.msra.mxu2 %v2498_v1  ;;  %v3110_v1 = vld [vmem:[#allocation5 + $0x4d4] sm:$0xf0]  ;;  %v2294_v12 = vor.u32 %v3016_v3, %v2291_v4  ;;  %v2721_v3 = vld [vmem:[#allocation5 + $0x548] sm:$0xf] }
  0x8d   :  { %1523 = vmatpush.bf16.msrb.mxu0 %v2338_v23  ;;  %v2658_v11 = vor.u32 %v3110_v1, %v2657_v63  ;;  %v2642_v23 = vor.u32 %v3106_v16, %v2641_v15  ;;  %v2964_v63 = vld [vmem:[#allocation5 + $0x4c] sm:$0xf]  ;;  %v2594_v1 = vor.u32 %v3094_v57, %v2593_v56  ;;  %v3126_v4 = vld [vmem:[#allocation5 + $0x554] sm:$0xf0]  ;;  %v2705_v16 = vld [vmem:[#allocation5 + $0x528] sm:$0xf] }
  0x8e   :  { %1495 = vmatpush.bf16.msrb.mxu1 %v2082_v20  ;;  %v3108_v56 = vld [vmem:[#allocation5 + $0x4cc] sm:$0xf]  ;;  %v2659_v57 = vld [vmem:[#allocation5 + $0x4d8] sm:$0xf0] }
  0x8f   :  { %1508 = vmatpush.bf16.msra.mxu3 %v2226_v17  ;;  %v3012_v17 = vld [vmem:[#allocation5 + $0x1cc] sm:$0xf] }
  0x90   :  { %1536 = vmatpush.bf16.msra.mxu2 %v2482_v14  ;;  %v3142_v14 = vld [vmem:[#allocation5 + $0x5d4] sm:$0xf0]  ;;  %v2278_v24 = vor.u32 %v3012_v17, %v2275_v18  ;;  %v2561_v18 = vld [vmem:[#allocation5 + $0x408] sm:$0xf] }
  0x91   :  { %1524 = vmatpush.bf16.msrb.mxu0 %v2322_v36  ;;  %v2786_v20 = vor.u32 %v3142_v14, %v2785_v13  ;;  %v2067_v13 = vld [vmem:[#allocation5 + $0x38] sm:$0xf0]  ;;  %v3122_v17 = vld [vmem:[#allocation5 + $0x534] sm:$0xf0] }
  0x92   :  { %1496 = vmatpush.bf16.msrb.mxu1 %v2066_v32 }
  0x93   :  { %1509 = vmatpush.bf16.msra.mxu3 %v2210_v29  ;;  %v3008_v29 = vld [vmem:[#allocation5 + $0x1ac] sm:$0xf] }
  0x94   :  { %1537 = vmatpush.bf16.msra.mxu2 %v2466_v26  ;;  %v3138_v26 = vld [vmem:[#allocation5 + $0x5b4] sm:$0xf0]  ;;  %v2262_v36 = vor.u32 %v3008_v29, %v2259_v30 }
  0x95   :  { %1525 = vmatpush.bf16.msrb.mxu0 %v2306_v59  ;;  %v2770_v32 = vor.u32 %v3138_v26, %v2769_v25  ;;  %v2227_v59 = vld [vmem:[#allocation5 + $0x178] sm:$0xf0]  ;;  %v2706_v25 = vor.u32 %v3122_v17, %v2705_v16  ;;  %v2689_v26 = vld [vmem:[#allocation5 + $0x508] sm:$0xf] }
  0x96   :  { %1497 = vmatpush.bf16.msrb.mxu1 %v2050_v52  ;;  %v2737_v52 = vld [vmem:[#allocation5 + $0x568] sm:$0xf]  ;;  %v2499_v17 = vld [vmem:[#allocation5 + $0x398] sm:$0xf0] }
  0x97   :  { %1510 = vmatpush.bf16.msra.mxu3 %v2194_v47  ;;  %v2968_v47 = vld [vmem:[#allocation5 + $0x6c] sm:$0xf]  ;;  %v2738_v62 = vor.u32 %v3130_v53, %v2737_v52  ;;  %v2531_v53 = vld [vmem:[#allocation5 + $0x3d8] sm:$0xf0] }
  0x98   :  { %1538 = vmatpush.bf16.msra.mxu2 %v2450_v41  ;;  %1526 = vmatmul.bf16.vlgmr.msrb.gmra.mxu0 %v3384_v54  ;;  %v3098_v41 = vld [vmem:[#allocation5 + $0x474] sm:$0xf0]  ;;  %v2102_v61 = vor.u32 %v2968_v47, %v2099_v48 }
  0x99   :  { %1581 = vmatpush.bf16.msra.mxu0 %v2818_v2  ;;  %1498 = vmatmul.bf16.vlgmr.msrb.gmra.mxu1 %v3386_v55  ;;  %v2610_v49 = vor.u32 %v3098_v41, %v2609_v40  ;;  %v2403_v40 = vld [vmem:[#allocation5 + $0x2d8] sm:$0xf0]  ;;  %v2988_v41 = vld [vmem:[#allocation5 + $0x10c] sm:$0xf] }
  0x9a   :  { %1546 = vmatpush.bf16.msra.mxu1 %v2674_v58  ;;  %v3000_v58 = vld [vmem:[#allocation5 + $0x16c] sm:$0xf]  ;;  %v2182_v52 = vor.u32 %v2988_v41, %v2179_v43  ;;  %v2595_v43 = vld [vmem:[#allocation5 + $0x458] sm:$0xf0] }
  0x9b   :  { %1511 = vmatpush.bf16.msra.mxu3 %v2178_v5  ;;  %v2230_v2 = vor.u32 %v3000_v58, %v2227_v59  ;;  %v2577_v5 = vld [vmem:[#allocation5 + $0x428] sm:$0xf]  ;;  %v3040_v59 = vld [vmem:[#allocation5 + $0x2ac] sm:$0xf] }
  0x9c   :  { %1539 = vmatpush.bf16.msra.mxu2 %v2434_v0  ;;  %v2083_v0 = vld [vmem:[#allocation5 + $0x58] sm:$0xf0]  ;;  %v3092_v41 = vld [vmem:[#allocation5 + $0x44c] sm:$0xf] }
  0x9d   :  { %1602 = vmatpush.bf16.msrb.mxu0 %v2294_v12  ;;  %v2086_v10 = vor.u32 %v2964_v63, %v2083_v0  ;;  %v2960_v12 = vld [vmem:[#allocation5 + $0x2c] sm:$0xf]  ;;  %v2787_v63 = vld [vmem:[#allocation5 + $0x5d8] sm:$0xf0] }
  0x9e   :  { %1547 = vmatpush.bf16.msra.mxu1 %v2658_v11  ;;  %1512 = vmatmul.bf16.vlgmr.msra.gmra.mxu3 %v3392_v8  ;;  %v2722_v11 = vor.u32 %v3126_v4, %v2721_v3  ;;  %v2070_v22 = vor.u32 %v2960_v12, %v2067_v13  ;;  %v2515_v4 = vld [vmem:[#allocation5 + $0x3b8] sm:$0xf0] }
  0x9f   :  { %1560 = vmatpush.bf16.msrb.mxu3 %v2802_v7  ;;  %1540 = vmatmul.bf16.vlgmr.msra.gmra.mxu2 %v3388_v60  ;;  %v2996_v7 = vld [vmem:[#allocation5 + $0x14c] sm:$0xf]  ;;  %v2771_v12 = vld [vmem:[#allocation5 + $0x5b8] sm:$0xf0] }
  0xa0   :  { %1588 = vmatpush.bf16.msrb.mxu2 %v2166_v6  ;;  %v3090_v6 = vld [vmem:[#allocation5 + $0x434] sm:$0xf0]  ;;  %v2214_v15 = vor.u32 %v2996_v7, %v2211_v9  ;;  %v3036_v9 = vld [vmem:[#allocation5 + $0x28c] sm:$0xf] }
  0xa1   :  { %1603 = vmatpush.bf16.msrb.mxu0 %v2278_v24  ;;  %v2578_v14 = vor.u32 %v3090_v6, %v2577_v5  ;;  %v2419_v24 = vld [vmem:[#allocation5 + $0x2f8] sm:$0xf0]  ;;  %v3104_v5 = vld [vmem:[#allocation5 + $0x4ac] sm:$0xf] }
  0xa2   :  { %1548 = vmatpush.bf16.msra.mxu1 %v2642_v23  ;;  %v3048_v23 = vld [vmem:[#allocation5 + $0x2ec] sm:$0xf]  ;;  %v2643_v6 = vld [vmem:[#allocation5 + $0x4b8] sm:$0xf0] }
  0xa3   :  { %1561 = vmatpush.bf16.msrb.mxu3 %v2786_v20  ;;  %v2992_v20 = vld [vmem:[#allocation5 + $0x12c] sm:$0xf]  ;;  %v2422_v34 = vor.u32 %v3048_v23, %v2419_v24 }
  0xa4   :  { %1589 = vmatpush.bf16.msrb.mxu2 %v2150_v19  ;;  %v3086_v19 = vld [vmem:[#allocation5 + $0x414] sm:$0xf0]  ;;  %v2198_v30 = vor.u32 %v2992_v20, %v2195_v21  ;;  %v3032_v21 = vld [vmem:[#allocation5 + $0x26c] sm:$0xf] }
  0xa5   :  { %1604 = vmatpush.bf16.msrb.mxu0 %v2262_v36  ;;  %v2562_v29 = vor.u32 %v3086_v19, %v2561_v18  ;;  %v2675_v36 = vld [vmem:[#allocation5 + $0x4f8] sm:$0xf0]  ;;  %v3100_v18 = vld [vmem:[#allocation5 + $0x48c] sm:$0xf] }
  0xa6   :  { %1549 = vmatpush.bf16.msra.mxu1 %v2626_v35  ;;  %v3112_v35 = vld [vmem:[#allocation5 + $0x4ec] sm:$0xf]  ;;  %v2627_v19 = vld [vmem:[#allocation5 + $0x498] sm:$0xf0] }
  0xa7   :  { %1562 = vmatpush.bf16.msrb.mxu3 %v2770_v32  ;;  %v3080_v32 = vld [vmem:[#allocation5 + $0x3ec] sm:$0xf]  ;;  %v2678_v48 = vor.u32 %v3112_v35, %v2675_v36 }
  0xa8   :  { %1590 = vmatpush.bf16.msrb.mxu2 %v2134_v31  ;;  %2825 = vmatmul.msk.bf16.vlgmr.msra.gmra.mxu0 %vm1290_vm0, %v3396_v50  ;;  %v3118_v31 = vld [vmem:[#allocation5 + $0x514] sm:$0xf0]  ;;  %v2550_v47 = vor.u32 %v3080_v32, %v2547_v33  ;;  %v3132_v23 = vld [vmem:[#allocation5 + $0x58c] sm:$0xf] }
  0xa9   :  { %1605 = vmatpush.bf16.msrb.mxu0 %v2246_v51  ;;  %v2690_v44 = vor.u32 %v3118_v31, %v2689_v26  ;;  %v2406_v51 = vor.u32 %v3044_v38, %v2403_v40  ;;  %v3064_v26 = vld [vmem:[#allocation5 + $0x36c] sm:$0xf]  ;;  %v2467_v40 = vld [vmem:[#allocation5 + $0x358] sm:$0xf0] }
  0xaa   :  { %1550 = vmatpush.bf16.msra.mxu1 %v2610_v49  ;;  %v3076_v49 = vld [vmem:[#allocation5 + $0x3cc] sm:$0xf]  ;;  %v2486_v35 = vor.u32 %v3064_v26, %v2483_v28  ;;  %v3157_v26 = vld [vmem:[#allocation8 + $0x30] sm:$0xff] }
  0xab   :  { %1563 = vmatpush.bf16.msrb.mxu3 %v2754_v46  ;;  %v2803_v46 = vld [vmem:[#allocation5 + $0x5f8] sm:$0xf0]  ;;  %v2534_v0 = vor.u32 %v3076_v49, %v2531_v53  ;;  %v3028_v32 = vld [vmem:[#allocation5 + $0x24c] sm:$0xf] }
  0xac   :  { %1591 = vmatpush.bf16.msrb.mxu2 %v2118_v45  ;;  %v3144_v45 = vld [vmem:[#allocation5 + $0x5ec] sm:$0xf] }
  0xad   :  { %1606 = vmatpush.bf16.msrb.mxu0 %v2230_v2  ;;  %v2806_v58 = vor.u32 %v3144_v45, %v2803_v46  ;;  %v3072_v2 = vld [vmem:[#allocation5 + $0x3ac] sm:$0xf]  ;;  %v2323_v46 = vld [vmem:[#allocation5 + $0x238] sm:$0xf0] }
  0xae   :  { %1551 = vmatpush.bf16.msra.mxu1 %v2594_v1  ;;  %v2662_v1 = vor.u32 %v3108_v56, %v2659_v57  ;;  %v2518_v13 = vor.u32 %v3072_v2, %v2515_v4  ;;  %v3128_v33 = vld [vmem:[#allocation5 + $0x56c] sm:$0xf]  ;;  %v2451_v57 = vld [vmem:[#allocation5 + $0x338] sm:$0xf0] }
  0xaf   :  { %1564 = vmatpush.bf16.msrb.mxu3 %v2738_v62  ;;  %v3140_v62 = vld [vmem:[#allocation5 + $0x5cc] sm:$0xf]  ;;  %v2707_v2 = vld [vmem:[#allocation5 + $0x538] sm:$0xf0] }
  0xb0   :  { %1592 = vmatpush.bf16.msrb.mxu2 %v2102_v61  ;;  %v2387_v61 = vld [vmem:[#allocation5 + $0x2b8] sm:$0xf0]  ;;  %v2790_v7 = vor.u32 %v3140_v62, %v2787_v63  ;;  %v3060_v38 = vld [vmem:[#allocation5 + $0x34c] sm:$0xf] }
  0xb1   :  { %1607 = vmatpush.bf16.msrb.mxu0 %v2214_v15  ;;  %v2390_v3 = vor.u32 %v3040_v59, %v2387_v61  ;;  %v3068_v15 = vld [vmem:[#allocation5 + $0x38c] sm:$0xf]  ;;  %v2470_v49 = vor.u32 %v3060_v38, %v2467_v40  ;;  %v2579_v59 = vld [vmem:[#allocation5 + $0x438] sm:$0xf0] }
  0xb2   :  { %1552 = vmatpush.bf16.msra.mxu1 %v2578_v14  ;;  %v2646_v14 = vor.u32 %v3104_v5, %v2643_v6  ;;  %v2502_v24 = vor.u32 %v3068_v15, %v2499_v17  ;;  %v3024_v45 = vld [vmem:[#allocation5 + $0x22c] sm:$0xf]  ;;  %v2819_v4 = vld [vmem:[#allocation5 + $0x618] sm:$0xf0] }
  0xb3   :  { %1565 = vmatpush.bf16.msrb.mxu3 %v2722_v11  ;;  %v3136_v11 = vld [vmem:[#allocation5 + $0x5ac] sm:$0xf]  ;;  %v2326_v56 = vor.u32 %v3024_v45, %v2323_v46  ;;  %v3154_v40 = vld [vmem:[#allocation8 + $0x18] sm:$0xff]  ;;  %v3153_v46 = vld [vmem:[#allocation8 + $0x10] sm:$0xff] }
  0xb4   :  { %1593 = vmatpush.bf16.msrb.mxu2 %v2086_v10  ;;  %v2371_v10 = vld [vmem:[#allocation5 + $0x298] sm:$0xf0]  ;;  %v2774_v20 = vor.u32 %v3136_v11, %v2771_v12  ;;  %v3020_v63 = vld [vmem:[#allocation5 + $0x20c] sm:$0xf] }
  0xb5   :  { %1608 = vmatpush.bf16.msrb.mxu0 %v2198_v30  ;;  %v2374_v16 = vor.u32 %v3036_v9, %v2371_v10  ;;  %v2611_v30 = vld [vmem:[#allocation5 + $0x478] sm:$0xf0]  ;;  %v3052_v10 = vld [vmem:[#allocation5 + $0x30c] sm:$0xf] }
  0xb6   :  { %1553 = vmatpush.bf16.msra.mxu1 %v2562_v29  ;;  %v3096_v29 = vld [vmem:[#allocation5 + $0x46c] sm:$0xf]  ;;  %v2435_v11 = vld [vmem:[#allocation5 + $0x318] sm:$0xf0] }
  0xb7   :  { %1566 = vmatpush.bf16.msrb.mxu3 %v2706_v25  ;;  %v2630_v25 = vor.u32 %v3100_v18, %v2627_v19  ;;  %v2614_v36 = vor.u32 %v3096_v29, %v2611_v30  ;;  %v3116_v17 = vld [vmem:[#allocation5 + $0x50c] sm:$0xf]  ;;  %v2691_v18 = vld [vmem:[#allocation5 + $0x518] sm:$0xf0]  ;;  %v2438_v19 = vor.u32 %v3052_v10, %v2435_v11 }
  0xb8   :  { %1594 = vmatpush.bf16.msrb.mxu2 %v2070_v22  ;;  %v2355_v22 = vld [vmem:[#allocation5 + $0x278] sm:$0xf0]  ;;  %v1303_v53 = vpop.f32.mrf.mxu0  ;;  %v3156_v30 = vld [vmem:[#allocation8 + $0x28] sm:$0xff] }
  0xb9   :  { %1554 = vmatmul.bf16.vlgmr.msra.gmra.mxu1 %v3400_v37  ;;  %1609 = vmatpush.bf16.msrb.mxu0 %v2182_v52  ;;  %v2358_v27 = vor.u32 %v3032_v21, %v2355_v22  ;;  %v3056_v52 = vld [vmem:[#allocation5 + $0x32c] sm:$0xf]  ;;  %v3158_v21 = vld [vmem:[#allocation8 + $0x38] sm:$0xff] }
  0xba   :  { %1616 = vmatpush.bf16.msrb.mxu1 %v2422_v34  ;;  %v2739_v34 = vld [vmem:[#allocation5 + $0x578] sm:$0xf0]  ;;  %v2454_v5 = vor.u32 %v3056_v52, %v2451_v57  ;;  %v3152_v52 = vld [vmem:[#allocation8 + $0x8] sm:$0xff] }
  0xbb   :  { %1567 = vmatpush.bf16.msrb.mxu3 %v2690_v44  ;;  %v2742_v44 = vor.u32 %v3128_v33, %v2739_v34  ;;  %v3155_v33 = vld [vmem:[#allocation8 + $0x20] sm:$0xff] }
  0xbc   :  { %1595 = vmatpush.bf16.msrb.mxu2 %v2054_v39  ;;  %1610 = vmatmul.bf16.vlgmr.msrb.gmra.mxu0 %v3392_v8  ;;  %v2339_v8 = vld [vmem:[#allocation5 + $0x258] sm:$0xf0]  ;;  %v1317_v61 = vpop.f32.mrf.mxu1 }
  0xbd   :  { %1658 = vmatpush.bf16.msra.mxu0 %v2806_v58  ;;  %v2342_v39 = vor.u32 %v3028_v32, %v2339_v8  ;;  %v3088_v58 = vld [vmem:[#allocation5 + $0x42c] sm:$0xf] }
  0xbe   :  { %1617 = vmatpush.bf16.msrb.mxu1 %v2406_v51  ;;  %1568 = vmatmul.bf16.vlgmr.msrb.gmra.mxu3 %v3402_v42  ;;  %v2598_v51 = vor.u32 %v3092_v41, %v2595_v43  ;;  %v2582_v6 = vor.u32 %v3088_v58, %v2579_v59  ;;  %v3165_v43 = vld [vmem:[#allocation8 + $0x70] sm:$0xff]  ;;  %v3151_v58 = vld [vmem:[#allocation8] sm:$0xff] }
  0xbf   :  { %1630 = vmatpush.bf16.msra.mxu3 %v2550_v47  ;;  %1596 = vmatmul.bf16.vlgmr.msrb.gmra.mxu2 %v3386_v55  ;;  %v2755_v55 = vld [vmem:[#allocation5 + $0x598] sm:$0xf0]  ;;  %v3124_v47 = vld [vmem:[#allocation5 + $0x54c] sm:$0xf] }
  0xc0   :  { %1644 = vmatpush.bf16.msra.mxu2 %v2678_v48  ;;  %v2758_v31 = vor.u32 %v3132_v23, %v2755_v55  ;;  %v2723_v48 = vld [vmem:[#allocation5 + $0x558] sm:$0xf0]  ;;  %v2694_v23 = vor.u32 %v3116_v17, %v2691_v18  ;;  %v1305_v55 = vpop.f32.mrf.mxu0 }
  0xc1   :  { %1659 = vmatpush.bf16.msra.mxu0 %v2790_v7  ;;  %v2726_v62 = vor.u32 %v3124_v47, %v2723_v48  ;;  %v1331_v7 = vpop.f32.mrf.mxu2  ;;  %v3164_v48 = vld [vmem:[#allocation8 + $0x68] sm:$0xff] }
  0xc2   :  { %1618 = vmatpush.bf16.msrb.mxu1 %v2390_v3  ;;  %v3148_v3 = vld [vmem:[#allocation5 + $0x60c] sm:$0xf] }
  0xc3   :  { %1631 = vmatpush.bf16.msra.mxu3 %v2534_v0  ;;  %v2307_v0 = vld [vmem:[#allocation5 + $0x218] sm:$0xf0]  ;;  %v2822_v15 = vor.u32 %v3148_v3, %v2819_v4  ;;  %v3159_v4 = vld [vmem:[#allocation8 + $0x40] sm:$0xff] }
  0xc4   :  { %1645 = vmatpush.bf16.msra.mxu2 %v2662_v1  ;;  %v3120_v1 = vld [vmem:[#allocation5 + $0x52c] sm:$0xf]  ;;  %v2310_v9 = vor.u32 %v3020_v63, %v2307_v0  ;;  %v3161_v0 = vld [vmem:[#allocation8 + $0x50] sm:$0xff] }
  0xc5   :  { %1660 = vmatpush.bf16.msra.mxu0 %v2774_v20  ;;  %v2710_v12 = vor.u32 %v3120_v1, %v2707_v2  ;;  %v3160_v1 = vld [vmem:[#allocation8 + $0x48] sm:$0xff] }
  0xc6   :  { %1619 = vmatpush.bf16.msrb.mxu1 %v2374_v16  ;;  %v3424_v16 = vld [vmem:[#allocation7] sm:$0xf] }
  0xc7   :  { %1632 = vmatpush.bf16.msra.mxu3 %v2518_v13  ;;  %v3084_v13 = vld [vmem:[#allocation5 + $0x40c] sm:$0xf]  ;;  %v302_v22 = vperm.slane %v3424_v16, 0 }
  0xc8   :  { %1646 = vmatpush.bf16.msra.mxu2 %v2646_v14  ;;  %v2563_v14 = vld [vmem:[#allocation5 + $0x418] sm:$0xf0] }
  0xc9   :  { %1661 = vmatpush.bf16.msra.mxu0 %v2758_v31  ;;  %v2566_v20 = vor.u32 %v3084_v13, %v2563_v14  ;;  %v1306_v28 = vadd.f32 %v1305_v55, %v302_v22  ;;  %v1333_v29 = vpop.f32.mrf.mxu2  ;;  %v3173_v55 = vld [vmem:[#allocation8 + $0xb0] sm:$0xff] }
  0xca   :  { %1620 = vmatpush.bf16.msrb.mxu1 %v2358_v27  ;;  %v1304_v27 = vadd.f32 %v1303_v53, %v302_v22 }
  0xcb   :  { %1633 = vmatpush.bf16.msra.mxu3 %v2502_v24  ;;  %v1319_v24 = vpop.f32.mrf.mxu1 }
  0xcc   :  { %1647 = vmatpush.bf16.msra.mxu2 %v2630_v25  ;;  %v1345_v25 = vpop.f32.mrf.mxu3  ;;  %v1318_v31 = vadd.f32 %v1317_v61, %v1304_v27  ;;  %v1320_v32 = vadd.f32 %v1319_v24, %v1306_v28  ;;  %v3162_v61 = vld [vmem:[#allocation8 + $0x58] sm:$0xff] }
  0xcd   :  { %1662 = vmatpush.bf16.msra.mxu0 %v2742_v44 }
  0xce   :  { %1621 = vmatpush.bf16.msrb.mxu1 %v2342_v39  ;;  %v1332_v34 = vadd.f32 %v1331_v7, %v1318_v31  ;;  %v3166_v39 = vld [vmem:[#allocation8 + $0x78] sm:$0xff]  ;;  %v303_v7 = vperm.slane %v3424_v16, 1 }
  0xcf   :  { %1634 = vmatpush.bf16.msra.mxu3 %v2486_v35  ;;  %v1334_v35 = vadd.f32 %v1333_v29, %v1320_v32 }
  0xd0   :  { %1648 = vmatpush.bf16.msra.mxu2 %v2614_v36 }
  0xd1   :  { %1663 = vmatpush.bf16.msra.mxu0 %v2726_v62  ;;  %v1387_v38 = vpop.f32.mrf.mxu2 }
  0xd2   :  { %1622 = vmatpush.bf16.msrb.mxu1 %v2326_v56  ;;  %v3163_v56 = vld [vmem:[#allocation8 + $0x60] sm:$0xff] }
  0xd3   :  { %1635 = vmatpush.bf16.msra.mxu3 %v2470_v49 }
  0xd4   :  { %1649 = vmatpush.bf16.msra.mxu2 %v2598_v51  ;;  %v1347_v36 = vpop.f32.mrf.mxu3 }
  0xd5   :  { %1664 = vmatpush.bf16.msra.mxu0 %v2710_v12 }
  0xd6   :  { %1623 = vmatpush.bf16.msrb.mxu1 %v2310_v9  ;;  %v1373_v8 = vpop.f32.mrf.mxu1 }
  0xd7   :  { %1636 = vmatpush.bf16.msra.mxu3 %v2454_v5 }
  0xd8   :  { %1650 = vmatpush.bf16.msra.mxu2 %v2582_v6 }
  0xd9   :  { %1624 = vmatmul.bf16.vlgmr.msrb.gmra.mxu1 %v3384_v54  ;;  %1665 = vmatpush.bf16.msra.mxu0 %v2694_v23  ;;  %v1359_v54 = vpop.f32.mrf.mxu0  ;;  %v1389_v51 = vpop.f32.mrf.mxu2 }
  0xda   :  { %1679 = vmatpush.bf16.msra.mxu1 %v2822_v15 }
  0xdb   :  { %1637 = vmatpush.bf16.msra.mxu3 %v2438_v19 }
  0xdc   :  { %1651 = vmatpush.bf16.msra.mxu2 %v2566_v20  ;;  %1666 = vmatmul.bf16.vlgmr.msra.gmra.mxu0 %v3402_v42 }
  0xde   :  { %1638 = vmatmul.bf16.vlgmr.msra.gmra.mxu3 %v3388_v60  ;;  %1972 = vmatpush.bf16.msrb.mxu1 %v3166_v39  ;;  %v1346_v60 = vadd.f32 %v1345_v25, %v1332_v34  ;;  %v1375_v45 = vpop.f32.mrf.mxu1 }
  0xdf   :  { %1958 = vmatpush.bf16.msrb.mxu3 %v3158_v21  ;;  %1652 = vmatmul.bf16.vlgmr.msra.gmra.mxu2 %v3400_v37  ;;  %v1348_v37 = vadd.f32 %v1347_v36, %v1334_v35  ;;  %v3174_v21 = vld [vmem:[#allocation8 + $0xb8] sm:$0xff] }
  0xe0   :  { %v1360_v42 = vadd.f32 %v1359_v54, %v1346_v60  ;;  %1986 = vmatpush.bf16.msrb.mxu2 %v3174_v21  ;;  %v3171_v54 = vld [vmem:[#allocation8 + $0xa0] sm:$0xff] }
  0xe1   :  { %v1361_v41 = vpop.f32.mrf.mxu0 }
  0xe2   :  { %v1362_v44 = vadd.f32 %v1361_v41, %v1348_v37  ;;  %1973 = vmatpush.bf16.msrb.mxu1 %v3165_v43  ;;  %v1374_v49 = vadd.f32 %v1373_v8, %v1360_v42  ;;  %v1415_v2 = vpop.f32.mrf.mxu2  ;;  %v3168_v37 = vld [vmem:[#allocation8 + $0x88] sm:$0xff]  ;;  %v3167_v41 = vld [vmem:[#allocation8 + $0x80] sm:$0xff] }
  0xe3   :  { %1959 = vmatpush.bf16.msrb.mxu3 %v3157_v26 }
  0xe4   :  { %v1376_v47 = vadd.f32 %v1375_v45, %v1362_v44  ;;  %v1388_v57 = vadd.f32 %v1387_v38, %v1374_v49  ;;  %1987 = vmatpush.bf16.msrb.mxu2 %v3173_v55  ;;  %v3170_v38 = vld [vmem:[#allocation8 + $0x98] sm:$0xff]  ;;  %v304_v44 = vperm.slane %v3424_v16, 2 }
  0xe6   :  { %1974 = vmatpush.bf16.msrb.mxu1 %v3164_v48  ;;  %v1390_v53 = vadd.f32 %v1389_v51, %v1376_v47  ;;  %v1686_v62 = vmax.f32 %v1388_v57, 0.0  ;;  %v3181_v48 = vld [vmem:[#allocation8 + $0xf0] sm:$0xff] }
  0xe7   :  { %1960 = vmatpush.bf16.msrb.mxu3 %v3156_v30  ;;  %v3172_v30 = vld [vmem:[#allocation8 + $0xa8] sm:$0xff] }
  0xe8   :  { %v1690_v59 = vmax.f32 %v1390_v53, 0.0  ;;  %1988 = vmatpush.bf16.msrb.mxu2 %v3172_v30 }
  0xe9   :  { %2826 = vmatmul.msk.bf16.vlgmr.msra.gmra.mxu1 %vm1290_vm0, %v3396_v50  ;;  %v1401_v50 = vpop.f32.mrf.mxu3 }
  0xea   :  { %1975 = vmatpush.bf16.msrb.mxu1 %v3163_v56  ;;  %v1694_v63 = vpack.c.bf16 %v1690_v59, %v1686_v62  ;;  %v1417_v9 = vpop.f32.mrf.mxu2  ;;  %v1402_v11 = vadd.f32 %v1401_v50, %v303_v7 }
  0xeb   :  { %1961 = vmatpush.bf16.msrb.mxu3 %v3155_v33 }
  0xec   :  { %v1416_v14 = vadd.f32 %v1415_v2, %v1402_v11  ;;  %1989 = vmatpush.bf16.msrb.mxu2 %v3171_v54 }
  0xee   :  { %1976 = vmatpush.bf16.msrb.mxu1 %v3162_v61  ;;  %v3179_v61 = vld [vmem:[#allocation8 + $0xe0] sm:$0xff] }
  0xef   :  { %1962 = vmatpush.bf16.msrb.mxu3 %v3154_v40  ;;  %v3169_v40 = vld [vmem:[#allocation8 + $0x90] sm:$0xff] }
  0xf0   :  { %1990 = vmatpush.bf16.msrb.mxu2 %v3170_v38 }
  0xf1   :  { %v1403_v3 = vpop.f32.mrf.mxu3 }
  0xf2   :  { %1977 = vmatpush.bf16.msrb.mxu1 %v3161_v0  ;;  %v1404_v12 = vadd.f32 %v1403_v3, %v303_v7 }
  0xf3   :  { %1963 = vmatpush.bf16.msrb.mxu3 %v3153_v46  ;;  %v3182_v46 = vld [vmem:[#allocation8 + $0xf8] sm:$0xff] }
  0xf4   :  { %v1418_v18 = vadd.f32 %v1417_v9, %v1404_v12  ;;  %1991 = vmatpush.bf16.msrb.mxu2 %v3169_v40  ;;  %2000 = vmatpush.bf16.msrb.mxu0 %v3182_v46 }
  0xf5   :  { %v1429_v5 = vpop.f32.mrf.mxu0 }
  0xf6   :  { %1978 = vmatpush.bf16.msrb.mxu1 %v3160_v1  ;;  %v1443_v10 = vpop.f32.mrf.mxu1  ;;  %v1430_v19 = vadd.f32 %v1429_v5, %v1416_v14 }
  0xf7   :  { %1964 = vmatpush.bf16.msrb.mxu3 %v3152_v52 }
  0xf8   :  { %v1444_v23 = vadd.f32 %v1443_v10, %v1430_v19  ;;  %1992 = vmatpush.bf16.msrb.mxu2 %v3168_v37  ;;  %2001 = vmatpush.bf16.msrb.mxu0 %v3181_v48  ;;  %v3177_v10 = vld [vmem:[#allocation8 + $0xd0] sm:$0xff] }
  0xfa   :  { %1979 = vmatpush.bf16.msrb.mxu1 %v3159_v4  ;;  %v3178_v4 = vld [vmem:[#allocation8 + $0xd8] sm:$0xff] }
  0xfb   :  { %1965 = vmatpush.bf16.msrb.mxu3 %v3151_v58  ;;  %v3180_v58 = vld [vmem:[#allocation8 + $0xe8] sm:$0xff] }
  0xfc   :  { %1993 = vmatpush.bf16.msrb.mxu2 %v3167_v41  ;;  %2002 = vmatpush.bf16.msrb.mxu0 %v3180_v58 }
  0xfd   :  { %v1457_v6 = vpop.f32.mrf.mxu3  ;;  %v1431_v15 = vpop.f32.mrf.mxu0 }
  0xfe   :  { %1966 = vmatmul.bf16.vlgmr.msrb.gmra.mxu3 %v1694_v63  ;;  %v1432_v20 = vadd.f32 %v1431_v15, %v1418_v18  ;;  %v1445_v22 = vpop.f32.mrf.mxu1  ;;  %v1458_v25 = vadd.f32 %v1457_v6, %v1444_v23  ;;  %v305_v23 = vperm.slane %v3424_v16, 3 }
 0x100   :  { %v1446_v26 = vadd.f32 %v1445_v22, %v1432_v20  ;;  %2003 = vmatpush.bf16.msrb.mxu0 %v3179_v61  ;;  %v3175_v22 = vld [vmem:[#allocation8 + $0xc0] sm:$0xff] }
 0x102   :  { %v1471_v17 = vpop.f32.mrf.mxu2 }
 0x103   :  { %v1472_v29 = vadd.f32 %v1471_v17, %v1458_v25  ;;  %v3176_v17 = vld [vmem:[#allocation8 + $0xc8] sm:$0xff] }
 0x104   :  { %2004 = vmatpush.bf16.msrb.mxu0 %v3178_v4 }
 0x105   :  { %v1459_v13 = vpop.f32.mrf.mxu3 }
 0x106   :  { %v1460_v27 = vadd.f32 %v1459_v13, %v1446_v26 }
 0x108   :  { %2005 = vmatpush.bf16.msrb.mxu0 %v3177_v10 }
 0x10a   :  { %v1473_v28 = vpop.f32.mrf.mxu2 }
 0x10b   :  { %v1474_v31 = vadd.f32 %v1473_v28, %v1460_v27 }
 0x10c   :  { %2006 = vmatpush.bf16.msrb.mxu0 %v3176_v17 }
 0x10d   :  { %v1485_v24 = vpop.f32.mrf.mxu3 }
 0x10e   :  { %v1486_v32 = vadd.f32 %v1485_v24, %v1472_v29 }
 0x110   :  { %v1687_v34 = vmax.f32 %v1486_v32, 0.0  ;;  %2007 = vmatpush.bf16.msrb.mxu0 %v3175_v22 }
 0x115   :  { %v1487_v8 = vpop.f32.mrf.mxu3  ;;  %v1527_v39 = vpop.f32.mrf.mxu0 }
 0x116   :  { %v1488_v33 = vadd.f32 %v1487_v8, %v1474_v31  ;;  %v1499_v60 = vpop.f32.mrf.mxu1 }
 0x117   :  { %v1500_v47 = vadd.f32 %v1499_v60, %v304_v44 }
 0x118   :  { %v1691_v35 = vmax.f32 %v1488_v33, 0.0 }
 0x11a   :  { %v1695_v36 = vpack.c.bf16 %v1691_v35, %v1687_v34 }
 0x11c   :  { %1980 = vmatmul.bf16.vlgmr.msrb.gmra.mxu1 %v1695_v36 }
 0x11d   :  { %v1529_v42 = vpop.f32.mrf.mxu0 }
 0x11e   :  { %v1501_v45 = vpop.f32.mrf.mxu1 }
 0x11f   :  { %v1502_v56 = vadd.f32 %v1501_v45, %v304_v44 }
 0x121   :  { %v1513_v43 = vpop.f32.mrf.mxu3 }
 0x122   :  { %v1541_v51 = vpop.f32.mrf.mxu2  ;;  %v1514_v53 = vadd.f32 %v1513_v43, %v1500_v47 }
 0x124   :  { %v1528_v59 = vadd.f32 %v1527_v39, %v1514_v53 }
 0x125   :  { %v1583_v49 = vpop.f32.mrf.mxu0 }
 0x126   :  { %v1542_v63 = vadd.f32 %v1541_v51, %v1528_v59 }
 0x129   :  { %v1515_v52 = vpop.f32.mrf.mxu3 }
 0x12a   :  { %v1516_v50 = vadd.f32 %v1515_v52, %v1502_v56  ;;  %v1543_v2 = vpop.f32.mrf.mxu2  ;;  %v3199_v52 = vld [vmem:[%s3449_s4] ss:$0 sm:$0xff] }
 0x12c   :  { %v1530_v0 = vadd.f32 %v1529_v42, %v1516_v50 }
 0x12d   :  { %v1585_v1 = vpop.f32.mrf.mxu0 }
 0x12e   :  { %v1544_v6 = vadd.f32 %v1543_v2, %v1530_v0 }
 0x136   :  { %v1555_v57 = vpop.f32.mrf.mxu1 }
 0x137   :  { %v1556_v3 = vadd.f32 %v1555_v57, %v1542_v63 }
 0x139   :  { %v1611_v15 = vpop.f32.mrf.mxu0 }
 0x13e   :  { %v1557_v5 = vpop.f32.mrf.mxu1 }
 0x13f   :  { %v1558_v9 = vadd.f32 %v1557_v5, %v1544_v6 }
 0x141   :  { %v1569_v62 = vpop.f32.mrf.mxu3  ;;  %v1613_v25 = vpop.f32.mrf.mxu0 }
 0x142   :  { %v1570_v7 = vadd.f32 %v1569_v62, %v1556_v3  ;;  %v1597_v18 = vpop.f32.mrf.mxu2 }
 0x143   :  { %v1598_v24 = vadd.f32 %v1597_v18, %v305_v23 }
 0x144   :  { %v1584_v12 = vadd.f32 %v1583_v49, %v1570_v7 }
 0x145   :  { %v1612_v27 = vadd.f32 %v1611_v15, %v1598_v24 }
 0x146   :  { %v1688_v19 = vmax.f32 %v1584_v12, 0.0 }
 0x149   :  { %v1571_v11 = vpop.f32.mrf.mxu3 }
 0x14a   :  { %v1572_v13 = vadd.f32 %v1571_v11, %v1558_v9  ;;  %v1599_v26 = vpop.f32.mrf.mxu2 }
 0x14b   :  { %v1600_v31 = vadd.f32 %v1599_v26, %v305_v23 }
 0x14c   :  { %v1586_v14 = vadd.f32 %v1585_v1, %v1572_v13 }
 0x14d   :  { %v1614_v33 = vadd.f32 %v1613_v25, %v1600_v31 }
 0x14e   :  { %v1692_v20 = vmax.f32 %v1586_v14, 0.0 }
 0x150   :  { %v1696_v21 = vpack.c.bf16 %v1692_v20, %v1688_v19 }
 0x152   :  { %1994 = vmatmul.bf16.vlgmr.msrb.gmra.mxu2 %v1696_v21 }
 0x156   :  { %v1625_v55 = vpop.f32.mrf.mxu1 }
 0x157   :  { %v1626_v29 = vadd.f32 %v1625_v55, %v1612_v27 }
 0x159   :  { %v1667_v54 = vpop.f32.mrf.mxu0 }
 0x15e   :  { %v1627_v28 = vpop.f32.mrf.mxu1 }
 0x15f   :  { %v1628_v35 = vadd.f32 %v1627_v28, %v1614_v33 }
 0x161   :  { %v1639_v30 = vpop.f32.mrf.mxu3  ;;  %v1669_v37 = vpop.f32.mrf.mxu0 }
 0x162   :  { %v1653_v32 = vpop.f32.mrf.mxu2  ;;  %v1640_v8 = vadd.f32 %v1639_v30, %v1626_v29 }
 0x164   :  { %v1654_v34 = vadd.f32 %v1653_v32, %v1640_v8 }
 0x166   :  { %v1681_v36 = vpop.f32.mrf.mxu1  ;;  %v1668_v39 = vadd.f32 %v1667_v54, %v1654_v34 }
 0x168   :  { %v1682_v43 = vadd.f32 %v1681_v36, %v1668_v39 }
 0x169   :  { %v1641_v38 = vpop.f32.mrf.mxu3 }
 0x16a   :  { %v1642_v16 = vadd.f32 %v1641_v38, %v1628_v35  ;;  %v1655_v40 = vpop.f32.mrf.mxu2  ;;  %v1689_v45 = vmax.f32 %v1682_v43, 0.0 }
 0x16c   :  { %v1656_v60 = vadd.f32 %v1655_v40, %v1642_v16 }
 0x16e   :  { %v1670_v41 = vadd.f32 %v1669_v37, %v1656_v60  ;;  %v1683_v42 = vpop.f32.mrf.mxu1 }
 0x170   :  { %v1684_v44 = vadd.f32 %v1683_v42, %v1670_v41 }
 0x172   :  { %v1693_v46 = vmax.f32 %v1684_v44, 0.0 }
 0x174   :  { %v1697_v47 = vpack.c.bf16 %v1693_v46, %v1689_v45 }
 0x176   :  { %2008 = vmatmul.bf16.vlgmr.msrb.gmra.mxu0 %v1697_v47 }
 0x181   :  { %v1967_v48 = vpop.f32.mrf.mxu3 }
 0x182   :  { %v1968_v58 = vadd.f32 %v3199_v52, %v1967_v48 }
 0x189   :  { %v1969_v53 = vpop.f32.mrf.mxu3 }
 0x18a   :  { %v1970_v59 = vadd.f32 %v3199_v52, %v1969_v53 }
 0x199   :  { %v1981_v49 = vpop.f32.mrf.mxu1 }
 0x19a   :  { %v1982_v61 = vadd.f32 %v1981_v49, %v1968_v58 }
 0x1a1   :  { %v1983_v57 = vpop.f32.mrf.mxu1 }
 0x1a2   :  { %v1984_v62 = vadd.f32 %v1983_v57, %v1970_v59 }
 0x1d5   :  { %v1995_v51 = vpop.f32.mrf.mxu2 }
 0x1d6   :  { %v1996_v63 = vadd.f32 %v1995_v51, %v1982_v61 }
 0x1dd   :  { %v1997_v50 = vpop.f32.mrf.mxu2 }
 0x1de   :  { %v1998_v0 = vadd.f32 %v1997_v50, %v1984_v62 }
 0x1f3   :  { %v2009_v56 = vpop.f32.mrf.mxu0 }
 0x1f4   :  { %v2010_v2 = vadd.f32 %v2009_v56, %v1996_v63 }
 0x1fb   :  { %v2011_v1 = vpop.f32.mrf.mxu0 }
 0x1fc   :  { %v2012_v3 = vadd.f32 %v2011_v1, %v1998_v0 }
 0x1fe   :  { %v3186_v4 = vpack.c.bf16 %v2012_v3, %v2010_v2 }
 0x200   :  { %3187 = vst [vmem:[#allocation10] sm:$0xff] %v3186_v4  }
 0x201   :  { %2030 = dma.vmem_to_hbm [thread:$0]  %s2023_s18, 128, %s2025_s21, [#allocation4], %s3336_s15, %s3336_s15, %s3337_s16  }
 0x202   :  { %3326 = dma.done.wait [#allocation4], 128  }
 0x203   :  { %3327 = vsyncadd [#allocation4], 4294967168 }
 0x204   :  { %2035 = vsyncpa [#allocation3], 1 }
 0x205   :  { %2036 = vsyncpa [#allocation6], 1 }
 0x206   :  { %2037 = vsyncpa [#allocation9], 1 }
 0x207   :  { %2038 = vsyncpa [#allocation4], 1 }

</bundles_post_ra>
